<compile_context>
chip_gen: v7x
topology: tpu7x:2x2x1
jax: 0.10.0
libtpu: 0.0.40
codegen_flags: <defaults>
</compile_context>

<pallas_src>
import functools
import math

import jax
import jax.numpy as jnp
from jax.experimental import pallas as pl
from jax.experimental.pallas import tpu as pltpu

LANE = 128
SUBLANE_BF16 = 16


# ----------------------------------------------------------------------------
# Small helpers.
# ----------------------------------------------------------------------------
def _round_up(v, m):
    return ((v + m - 1) // m) * m


def _pad_last(a, n):
    pad = n - a.shape[-1]
    if pad > 0:
        a = jnp.pad(a, [(0, 0)] * (a.ndim - 1) + [(0, pad)])
    return a


def _pick_row_tile(ho, wo_p, target_m=256, max_rows=8):
    """Largest divisor of ho that keeps M = ht*wo_p around `target_m`."""
    cap = max(1, min(max_rows, target_m // max(wo_p, 1), ho))
    for t in range(cap, 0, -1):
        if ho % t == 0:
            return t
    return 1


def fold_bn(gamma, beta, mean, var, eps=1e-5):
    scale = gamma / jnp.sqrt(var + eps)
    bias = beta - mean * scale
    return scale, bias


# ----------------------------------------------------------------------------
# Pallas kernel: one (batch, row-tile) step.
#   single K = 9*cin (+ cs) matmul  ->  + folded bias  (-> + residual) -> ReLU
# ----------------------------------------------------------------------------
def _conv3x3_bn_kernel(x_ref, w_ref, b_ref, *rest, cin, stride, ht, wo, wo_p,
                       mode, apply_relu):
    """x_ref : (1, Hs, Ws, stride^2*cin) bf16 tap-source slab (halo included)
       w_ref : (Ktot, coutp) bf16 folded weights (conv taps [+ 1x1 proj rows])
       b_ref : (1, coutp)   f32 folded bias (conv BN [+ proj BN])
       rest  : [s_ref] proj input or identity residual, then o_ref."""
    if mode == "none":
        (o_ref,) = rest
        s_ref = None
    else:
        s_ref, o_ref = rest
    coutp = o_ref.shape[-1]
    hal = 2 if stride == 1 else 1

    row0 = pl.multiple_of(pl.program_id(1) * ht, ht)
    xt = x_ref[0, pl.ds(row0, ht + hal), :, :]        # (ht+hal, Ws, s*s*cin)

    # Build the (ht*wo_p, Ktot) patch slab: 9 contiguous tap windows (plus the
    # projection-shortcut channels) concatenated along the contraction axis —
    # in-VMEM concat for this tile only, NOT an HBM im2col.
    cols = []
    for kh in range(3):
        for kw in range(3):
            ro, co = kh // stride, kw // stride
            p = (kh % stride) * stride + (kw % stride)
            cols.append(xt[ro:ro + ht, co:co + wo_p, p * cin:(p + 1) * cin])
    if mode == "proj":
        cols.append(s_ref[0, pl.ds(row0, ht), :, :])  # (ht, wo_p, cs)
    patch = jnp.concatenate(cols, axis=-1)            # (ht, wo_p, Ktot) bf16
    patch = patch.reshape(ht * wo_p, patch.shape[-1])  # no-op: wo_p % 16 == 0

    acc = jnp.dot(patch, w_ref[...], preferred_element_type=jnp.float32)
    acc = acc + b_ref[...]                            # folded BN bias(es)
    acc = acc.reshape(ht, wo_p, coutp)[:, :wo, :]     # drop padded W columns
    if mode == "identity":
        acc = acc + s_ref[0, pl.ds(row0, ht), :, :].astype(jnp.float32)
    if apply_relu:
        acc = jnp.maximum(acc, 0.0)
    o_ref[...] = acc.reshape(1, ht, wo, coutp).astype(o_ref.dtype)


# ----------------------------------------------------------------------------
# Wrapper: BN folding, tap-source slab construction, specs, pallas_call.
# ----------------------------------------------------------------------------
def fused_conv3x3_bn(x, w, bn, stride, *, shortcut=None, apply_relu=True,
                     out_dtype=jnp.bfloat16):
    """3x3 conv (pad=1, bias=False) + folded BN + optional fused shortcut + ReLU.

    x : (N, H, W, Cin_p) NHWC; Cin_p may exceed w's true Cin (padded
        activation from a previous call) — extra channels get zero weight rows.
    w : (3, 3, Cin, Cout) HWIO.   bn = (gamma, beta, mean, var) running stats.
    shortcut : None
             | ("proj", xs, w1x1, bn_s)  # xs: (N, Ho, Wo, Cs), already strided
             | ("identity", res)         # res: (N, Ho, Wo, Cout)
    Returns (N, Ho, Wo, Coutp); Coutp == Cout unless Cout > 128.
    """
    n, h, wdt, cin_p = x.shape
    assert w.shape[:2] == (3, 3) and w.shape[2] <= cin_p
    cout = w.shape[-1]
    s = stride
    ho = -(-h // s)
    wo = -(-wdt // s)
    wo_p = _round_up(wo, SUBLANE_BF16)                 # bf16 sublane multiple
    coutp = cout if cout <= LANE else _round_up(cout, LANE)

    # ---- fold BN scale into the weight slab (zero rows for padded Cin) -----
    scale, bias = fold_bn(*bn)
    w_full = jnp.pad(w, ((0, 0), (0, 0), (0, cin_p - w.shape[2]), (0, 0)))
    wf = (w_full * scale).reshape(9 * cin_p, cout)
    bf = bias

    # ---- tap-source slab ----------------------------------------------------
    if s == 1:
        hs_need, ws_need = ho + 2, wo_p + 2            # spatial halo pad only
        slab = jnp.pad(x, ((0, 0), (1, hs_need - h - 1),
                           (1, ws_need - wdt - 1), (0, 0)))
    else:                                              # s == 2: phase split,
        hq, wq = ho + 1, wo_p + 1                      # stacked along channels
        xp = jnp.pad(x, ((0, 0), (1, 2 * hq - h - 1),
                         (1, 2 * wq - wdt - 1), (0, 0)))
        slab = jnp.concatenate(
            [xp[:, i::2, j::2, :][:, :hq, :wq, :]
             for i in range(2) for j in range(2)], axis=-1)
    slab = slab.astype(jnp.bfloat16)
    hs_, ws_, cx = slab.shape[1:]

    # ---- shortcut handling --------------------------------------------------
    mode = "none"
    extra_in, extra_specs = [], []
    k_total = 9 * cin_p
    if shortcut is not None and shortcut[0] == "proj":
        mode = "proj"
        _, xs, w1, bn_s = shortcut
        assert xs.shape[1:3] == (ho, wo)
        cs = xs.shape[-1]
        ss_, bs_ = fold_bn(*bn_s)
        w1m = jnp.pad(w1.reshape(w1.shape[-2], cout),
                      ((0, cs - w1.shape[-2]), (0, 0)))
        wf = jnp.concatenate([wf, w1m * ss_], axis=0)  # append proj rows to K
        bf = bf + bs_                                  # combine both biases
        xs_b = jnp.pad(xs, ((0, 0), (0, 0), (0, wo_p - wo), (0, 0)))
        extra_in = [xs_b.astype(jnp.bfloat16)]
        extra_specs = [pl.BlockSpec((1, ho, wo_p, cs), lambda b, r: (b, 0, 0, 0))]
        k_total += cs
    elif shortcut is not None and shortcut[0] == "identity":
        mode = "identity"
        res = _pad_last(shortcut[1], coutp).astype(jnp.bfloat16)
        assert res.shape == (n, ho, wo, coutp)
        extra_in = [res]
        extra_specs = [pl.BlockSpec((1, ho, wo, coutp), lambda b, r: (b, 0, 0, 0))]

    wf = _pad_last(wf, coutp).astype(jnp.bfloat16)     # (k_total, coutp)
    bf = _pad_last(bf, coutp).reshape(1, coutp).astype(jnp.float32)

    ht = _pick_row_tile(ho, wo_p)
    nt = ho // ht

    inputs = [slab, wf, bf] + extra_in
    in_specs = [pl.BlockSpec((1, hs_, ws_, cx), lambda b, r: (b, 0, 0, 0)),
                pl.BlockSpec((k_total, coutp), lambda b, r: (0, 0)),
                pl.BlockSpec((1, coutp), lambda b, r: (0, 0))] + extra_specs

    # ---- VMEM budget from the actual per-step footprint (v7x: 64 MiB) ------
    step_bytes = (2 * math.prod(slab.shape[1:]) * 2
                  + sum(2 * math.prod(a.shape[1:]) * 2 for a in extra_in)
                  + 2 * (k_total * coutp * 2 + coutp * 4)
                  + 2 * ht * wo * coutp * 2
                  + 3 * ht * wo_p * (k_total * 2 + coutp * 4))
    vmem_limit = int(max(32 << 20, min(100 << 20, 2 * step_bytes + (4 << 20))))

    flops = 2 * n * ho * wo_p * k_total * coutp
    bytes_accessed = (sum(int(a.size) * a.dtype.itemsize for a in inputs)
                      + n * ho * wo * coutp * jnp.dtype(out_dtype).itemsize)

    kernel = functools.partial(_conv3x3_bn_kernel, cin=cin_p, stride=s, ht=ht,
                               wo=wo, wo_p=wo_p, mode=mode,
                               apply_relu=apply_relu)
    return pl.pallas_call(
        kernel,
        out_shape=jax.ShapeDtypeStruct((n, ho, wo, coutp), out_dtype),
        grid_spec=pltpu.PrefetchScalarGridSpec(
            num_scalar_prefetch=0,
            grid=(n, nt),                               # row tiles innermost
            in_specs=in_specs,
            out_specs=pl.BlockSpec((1, ht, wo, coutp),
                                   lambda b, r: (b, r, 0, 0)),
        ),
        compiler_params=pltpu.CompilerParams(
            dimension_semantics=("parallel", "parallel"),
            vmem_limit_bytes=vmem_limit,
        ),
        cost_estimate=pl.CostEstimate(flops=flops, transcendentals=0,
                                      bytes_accessed=bytes_accessed),
    )(*inputs)


# ----------------------------------------------------------------------------
# BasicBlock forward (exactly 2 pallas_calls) and pure-JAX reference.
# ----------------------------------------------------------------------------
def basic_block_forward(params, x, cin, cout, stride):
    """x: (N, H, W, Cin) NHWC -> (N, Ho, Wo, Cout) NHWC."""
    # conv3x3(stride) + BN + ReLU.  Possibly channel-padded output feeds conv2
    # directly (zero weight rows absorb padding — no slice round trip).
    y1 = fused_conv3x3_bn(x, params["w1"], params["bn1"], stride,
                          apply_relu=True)
    # conv3x3(1) + BN with shortcut branch, residual add and final ReLU fused.
    if stride != 1 or cin != cout:
        xs = x[:, ::stride, ::stride, :]
        shortcut = ("proj", xs, params["ws"], params["bns"])
    else:
        shortcut = ("identity", x)
    y2 = fused_conv3x3_bn(y1, params["w2"], params["bn2"], 1,
                          shortcut=shortcut, apply_relu=True)
    return y2[..., :cout]          # no-op for ResNet widths (cout <= 128 here)


def reference_forward(params, x, cin, cout, stride, eps=1e-5):
    def conv(z, w, s, pad):
        return jax.lax.conv_general_dilated(
            z, w, window_strides=(s, s), padding=[(pad, pad), (pad, pad)],
            dimension_numbers=("NHWC", "HWIO", "NHWC"))

    def bn(y, p):
        g, b, m, v = p
        return (y - m) / jnp.sqrt(v + eps) * g + b

    y = jax.nn.relu(bn(conv(x, params["w1"], stride, 1), params["bn1"]))
    y = bn(conv(y, params["w2"], 1, 1), params["bn2"])
    if stride != 1 or cin != cout:
        sc = bn(conv(x, params["ws"], stride, 0), params["bns"])
    else:
        sc = x
    return jax.nn.relu(y + sc)


def init_basic_block_params(key, cin, cout, stride):
    ks = jax.random.split(key, 6)

    def bn_params(k, c):
        k1, k2, k3, k4 = jax.random.split(k, 4)
        gamma = jax.random.uniform(k1, (c,), jnp.float32, 0.5, 1.5)
        beta = jax.random.normal(k2, (c,), jnp.float32) * 0.1
        mean = jax.random.normal(k3, (c,), jnp.float32) * 0.1
        var = jax.random.uniform(k4, (c,), jnp.float32, 0.5, 1.5)
        return (gamma, beta, mean, var)

    p = {
        "w1": jax.random.normal(ks[0], (3, 3, cin, cout), jnp.float32) * 0.1,
        "bn1": bn_params(ks[1], cout),
        "w2": jax.random.normal(ks[2], (3, 3, cout, cout), jnp.float32) * 0.1,
        "bn2": bn_params(ks[3], cout),
    }
    if stride != 1 or cin != cout:
        p["ws"] = jax.random.normal(ks[4], (1, 1, cin, cout), jnp.float32) * 0.1
        p["bns"] = bn_params(ks[5], cout)
    return p


def _check(out, ref, tag):
    err = jnp.max(jnp.abs(out.astype(jnp.float32) - ref))
    denom = jnp.max(jnp.abs(ref)) + 1e-6
    rel = float(err / denom)
    assert rel < 0.05, f"mismatch ({tag}): rel max err {rel:.4f}"  # bf16 ops


# ----------------------------------------------------------------------------
if __name__ == "__main__":
    key = jax.random.PRNGKey(0)
    k_x, k_x3, k_p1, k_p2 = jax.random.split(key, 4)

    fwd = jax.jit(basic_block_forward, static_argnums=(2, 3, 4))

    # Case 1: projection shortcut (stride=2, channel expansion 4 -> 8).
    N, H, W, cin, cout, stride = 2, 16, 16, 4, 8, 2
    x_nchw = jax.random.normal(k_x, (N, cin, H, W), jnp.float32)   # PyTorch NCHW
    x = jnp.transpose(x_nchw, (0, 2, 3, 1))                        # -> NHWC
    params = init_basic_block_params(k_p1, cin, cout, stride)
    out = jax.block_until_ready(fwd(params, x, cin, cout, stride))
    ref = reference_forward(params, x, cin, cout, stride)
    assert out.shape == (N, H // stride, W // stride, cout)
    _check(out, ref, "projection")

    # Case 2: identity shortcut (stride=1, cin == cout); exercises row tiling.
    cin2 = cout2 = 4
    x2 = jnp.transpose(jax.random.normal(k_x, (N, cin2, H, W), jnp.float32),
                       (0, 2, 3, 1))
    params2 = init_basic_block_params(k_p2, cin2, cout2, 1)
    out2 = jax.block_until_ready(fwd(params2, x2, cin2, cout2, 1))
    ref2 = reference_forward(params2, x2, cin2, cout2, 1)
    assert out2.shape == (N, H, W, cout2)
    _check(out2, ref2, "identity")

    # Case 3: odd spatial size with stride=2 (exercises the extra-pad path).
    H3 = W3 = 15
    x3 = jnp.transpose(jax.random.normal(k_x3, (N, cin, H3, W3), jnp.float32),
                       (0, 2, 3, 1))
    out3 = jax.block_until_ready(fwd(params, x3, cin, cout, stride))
    ref3 = reference_forward(params, x3, cin, cout, stride)
    assert out3.shape == (N, (H3 + 1) // 2, (W3 + 1) // 2, cout)
    _check(out3, ref3, "projection-odd")

    print("KERNEL_OK")
</pallas_src>

<mosaic_0001>
module attributes {stable_mosaic.version = 11 : i64} {
  func.func @_conv3x3_bn_kernel(%arg0: i32, %arg1: i32, %arg2: memref<1x9x17x16xbf16, #tpu.memory_space<vmem>>, %arg3: memref<36x8xbf16, #tpu.memory_space<vmem>>, %arg4: memref<1x8xf32, #tpu.memory_space<vmem>>, %arg5: memref<1x8x8x8xbf16, #tpu.memory_space<vmem>>) attributes {dimension_semantics = [#tpu.dimension_semantics<parallel>, #tpu.dimension_semantics<parallel>], iteration_bounds = array<i64: 2, 1>, scalar_prefetch = 0 : i64, scratch_operands = 0 : i64, tpu.core_type = #tpu.core_type<tc>, window_params = [{transform_indices = @transform_0, window_bounds = array<i64: 1, 9, 17, 16>}, {pipeline_mode = #tpu.pipeline_mode<synchronous>, transform_indices = @transform_1, window_bounds = array<i64: 36, 8>}, {pipeline_mode = #tpu.pipeline_mode<synchronous>, transform_indices = @transform_2, window_bounds = array<i64: 1, 8>}, {transform_indices = @transform_3, window_bounds = array<i64: 1, 8, 8, 8>}]} {
    %c8_i32 = arith.constant 8 : i32
    %0 = arith.muli %arg1, %c8_i32 : i32
    %1 = tpu.assume_multiple %0, 8 : i32
    %c0 = arith.constant 0 : index
    %2 = arith.index_cast %1 : i32 to index
    %c0_0 = arith.constant 0 : index
    %c0_1 = arith.constant 0 : index
    %3 = vector.load %arg2[%c0, %2, %c0_0, %c0_1] : memref<1x9x17x16xbf16, #tpu.memory_space<vmem>>, vector<1x9x17x16xbf16>
    %4 = vector.shape_cast %3 : vector<1x9x17x16xbf16> to vector<9x17x16xbf16>
    %5 = vector.extract_strided_slice %4 {offsets = [0, 0, 0], sizes = [8, 16, 4], strides = [1, 1, 1]} : vector<9x17x16xbf16> to vector<8x16x4xbf16>
    %6 = vector.extract_strided_slice %4 {offsets = [0, 0, 4], sizes = [8, 16, 4], strides = [1, 1, 1]} : vector<9x17x16xbf16> to vector<8x16x4xbf16>
    %7 = vector.extract_strided_slice %4 {offsets = [0, 1, 0], sizes = [8, 16, 4], strides = [1, 1, 1]} : vector<9x17x16xbf16> to vector<8x16x4xbf16>
    %8 = vector.extract_strided_slice %4 {offsets = [0, 0, 8], sizes = [8, 16, 4], strides = [1, 1, 1]} : vector<9x17x16xbf16> to vector<8x16x4xbf16>
    %9 = vector.extract_strided_slice %4 {offsets = [0, 0, 12], sizes = [8, 16, 4], strides = [1, 1, 1]} : vector<9x17x16xbf16> to vector<8x16x4xbf16>
    %10 = vector.extract_strided_slice %4 {offsets = [0, 1, 8], sizes = [8, 16, 4], strides = [1, 1, 1]} : vector<9x17x16xbf16> to vector<8x16x4xbf16>
    %11 = vector.extract_strided_slice %4 {offsets = [1, 0, 0], sizes = [8, 16, 4], strides = [1, 1, 1]} : vector<9x17x16xbf16> to vector<8x16x4xbf16>
    %12 = vector.extract_strided_slice %4 {offsets = [1, 0, 4], sizes = [8, 16, 4], strides = [1, 1, 1]} : vector<9x17x16xbf16> to vector<8x16x4xbf16>
    %13 = vector.extract_strided_slice %4 {offsets = [1, 1, 0], sizes = [8, 16, 4], strides = [1, 1, 1]} : vector<9x17x16xbf16> to vector<8x16x4xbf16>
    %14 = tpu.concatenate %5, %6, %7, %8, %9, %10, %11, %12, %13 in 2 : vector<8x16x4xbf16>, vector<8x16x4xbf16>, vector<8x16x4xbf16>, vector<8x16x4xbf16>, vector<8x16x4xbf16>, vector<8x16x4xbf16>, vector<8x16x4xbf16>, vector<8x16x4xbf16>, vector<8x16x4xbf16> -> vector<8x16x36xbf16>
    %15 = vector.shape_cast %14 : vector<8x16x36xbf16> to vector<128x36xbf16>
    %c0_2 = arith.constant 0 : index
    %c0_3 = arith.constant 0 : index
    %16 = vector.load %arg3[%c0_2, %c0_3] : memref<36x8xbf16, #tpu.memory_space<vmem>>, vector<36x8xbf16>
    %cst = arith.constant dense<0.000000e+00> : vector<128x8xf32>
    %17 = tpu.matmul %15, %16, %cst {dimension_numbers = #tpu.dot_dimension_numbers<[1], [0], [0], [1], [0, 0, 1, 1], [], []>} : vector<128x36xbf16>, vector<36x8xbf16>, vector<128x8xf32> -> vector<128x8xf32>
    %c0_4 = arith.constant 0 : index
    %c0_5 = arith.constant 0 : index
    %18 = vector.load %arg4[%c0_4, %c0_5] : memref<1x8xf32, #tpu.memory_space<vmem>>, vector<1x8xf32>
    %19 = vector.broadcast %18 : vector<1x8xf32> to vector<128x8xf32>
    %20 = arith.addf %17, %19 : vector<128x8xf32>
    %21 = vector.shape_cast %20 : vector<128x8xf32> to vector<8x16x8xf32>
    %22 = vector.extract_strided_slice %21 {offsets = [0, 0, 0], sizes = [8, 8, 8], strides = [1, 1, 1]} : vector<8x16x8xf32> to vector<8x8x8xf32>
    %cst_6 = arith.constant 0.000000e+00 : f32
    %23 = vector.broadcast %cst_6 : f32 to vector<8x8x8xf32>
    %24 = arith.maximumf %22, %23 : vector<8x8x8xf32>
    %25 = vector.shape_cast %24 : vector<8x8x8xf32> to vector<1x8x8x8xf32>
    %26 = arith.truncf %25 : vector<1x8x8x8xf32> to vector<1x8x8x8xbf16>
    %c0_7 = arith.constant 0 : index
    %c0_8 = arith.constant 0 : index
    %c0_9 = arith.constant 0 : index
    %c0_10 = arith.constant 0 : index
    %27 = vector.load %arg5[%c0_7, %c0_8, %c0_9, %c0_10] : memref<1x8x8x8xbf16, #tpu.memory_space<vmem>>, vector<1x8x8x8xbf16>
    tpu.vector_store %arg5[%c0_7, %c0_8, %c0_9, %c0_10], %26 {strides = array<i32>} : memref<1x8x8x8xbf16, #tpu.memory_space<vmem>>, vector<1x8x8x8xbf16>,
    return
  }
  func.func @transform_0(%arg0: i32, %arg1: i32) -> (i32, i32, i32, i32) {
    %c0_i32 = arith.constant 0 : i32
    %c0_i32_0 = arith.constant 0 : i32
    %c0_i32_1 = arith.constant 0 : i32
    %c0_i32_2 = arith.constant 0 : i32
    return %arg0, %c0_i32, %c0_i32_0, %c0_i32_1 : i32, i32, i32, i32
  }
  func.func @transform_1(%arg0: i32, %arg1: i32) -> (i32, i32) {
    %c0_i32 = arith.constant 0 : i32
    %c0_i32_0 = arith.constant 0 : i32
    %c0_i32_1 = arith.constant 0 : i32
    return %c0_i32, %c0_i32_0 : i32, i32
  }
  func.func @transform_2(%arg0: i32, %arg1: i32) -> (i32, i32) {
    %c0_i32 = arith.constant 0 : i32
    %c0_i32_0 = arith.constant 0 : i32
    %c0_i32_1 = arith.constant 0 : i32
    return %c0_i32, %c0_i32_0 : i32, i32
  }
  func.func @transform_3(%arg0: i32, %arg1: i32) -> (i32, i32, i32, i32) {
    %c0_i32 = arith.constant 0 : i32
    %c0_i32_0 = arith.constant 0 : i32
    %c0_i32_1 = arith.constant 0 : i32
    return %arg0, %arg1, %c0_i32, %c0_i32_0 : i32, i32, i32, i32
  }
}

module attributes {stable_mosaic.version = 11 : i64} {
  func.func @_conv3x3_bn_kernel(%arg0: i32, %arg1: i32, %arg2: memref<1x10x18x8xbf16, #tpu.memory_space<vmem>>, %arg3: memref<76x8xbf16, #tpu.memory_space<vmem>>, %arg4: memref<1x8xf32, #tpu.memory_space<vmem>>, %arg5: memref<1x8x16x4xbf16, #tpu.memory_space<vmem>>, %arg6: memref<1x8x8x8xbf16, #tpu.memory_space<vmem>>) attributes {dimension_semantics = [#tpu.dimension_semantics<parallel>, #tpu.dimension_semantics<parallel>], iteration_bounds = array<i64: 2, 1>, scalar_prefetch = 0 : i64, scratch_operands = 0 : i64, tpu.core_type = #tpu.core_type<tc>, window_params = [{transform_indices = @transform_0, window_bounds = array<i64: 1, 10, 18, 8>}, {pipeline_mode = #tpu.pipeline_mode<synchronous>, transform_indices = @transform_1, window_bounds = array<i64: 76, 8>}, {pipeline_mode = #tpu.pipeline_mode<synchronous>, transform_indices = @transform_2, window_bounds = array<i64: 1, 8>}, {transform_indices = @transform_3, window_bounds = array<i64: 1, 8, 16, 4>}, {transform_indices = @transform_4, window_bounds = array<i64: 1, 8, 8, 8>}]} {
    %c8_i32 = arith.constant 8 : i32
    %0 = arith.muli %arg1, %c8_i32 : i32
    %1 = tpu.assume_multiple %0, 8 : i32
    %c0 = arith.constant 0 : index
    %2 = arith.index_cast %1 : i32 to index
    %c0_0 = arith.constant 0 : index
    %c0_1 = arith.constant 0 : index
    %3 = vector.load %arg2[%c0, %2, %c0_0, %c0_1] : memref<1x10x18x8xbf16, #tpu.memory_space<vmem>>, vector<1x10x18x8xbf16>
    %4 = vector.shape_cast %3 : vector<1x10x18x8xbf16> to vector<10x18x8xbf16>
    %5 = vector.extract_strided_slice %4 {offsets = [0, 0, 0], sizes = [8, 16, 8], strides = [1, 1, 1]} : vector<10x18x8xbf16> to vector<8x16x8xbf16>
    %6 = vector.extract_strided_slice %4 {offsets = [0, 1, 0], sizes = [8, 16, 8], strides = [1, 1, 1]} : vector<10x18x8xbf16> to vector<8x16x8xbf16>
    %7 = vector.extract_strided_slice %4 {offsets = [0, 2, 0], sizes = [8, 16, 8], strides = [1, 1, 1]} : vector<10x18x8xbf16> to vector<8x16x8xbf16>
    %8 = vector.extract_strided_slice %4 {offsets = [1, 0, 0], sizes = [8, 16, 8], strides = [1, 1, 1]} : vector<10x18x8xbf16> to vector<8x16x8xbf16>
    %9 = vector.extract_strided_slice %4 {offsets = [1, 1, 0], sizes = [8, 16, 8], strides = [1, 1, 1]} : vector<10x18x8xbf16> to vector<8x16x8xbf16>
    %10 = vector.extract_strided_slice %4 {offsets = [1, 2, 0], sizes = [8, 16, 8], strides = [1, 1, 1]} : vector<10x18x8xbf16> to vector<8x16x8xbf16>
    %11 = vector.extract_strided_slice %4 {offsets = [2, 0, 0], sizes = [8, 16, 8], strides = [1, 1, 1]} : vector<10x18x8xbf16> to vector<8x16x8xbf16>
    %12 = vector.extract_strided_slice %4 {offsets = [2, 1, 0], sizes = [8, 16, 8], strides = [1, 1, 1]} : vector<10x18x8xbf16> to vector<8x16x8xbf16>
    %13 = vector.extract_strided_slice %4 {offsets = [2, 2, 0], sizes = [8, 16, 8], strides = [1, 1, 1]} : vector<10x18x8xbf16> to vector<8x16x8xbf16>
    %c0_2 = arith.constant 0 : index
    %14 = arith.index_cast %1 : i32 to index
    %c0_3 = arith.constant 0 : index
    %c0_4 = arith.constant 0 : index
    %15 = vector.load %arg5[%c0_2, %14, %c0_3, %c0_4] : memref<1x8x16x4xbf16, #tpu.memory_space<vmem>>, vector<1x8x16x4xbf16>
    %16 = vector.shape_cast %15 : vector<1x8x16x4xbf16> to vector<8x16x4xbf16>
    %17 = tpu.concatenate %5, %6, %7, %8, %9, %10, %11, %12, %13, %16 in 2 : vector<8x16x8xbf16>, vector<8x16x8xbf16>, vector<8x16x8xbf16>, vector<8x16x8xbf16>, vector<8x16x8xbf16>, vector<8x16x8xbf16>, vector<8x16x8xbf16>, vector<8x16x8xbf16>, vector<8x16x8xbf16>, vector<8x16x4xbf16> -> vector<8x16x76xbf16>
    %18 = vector.shape_cast %17 : vector<8x16x76xbf16> to vector<128x76xbf16>
    %c0_5 = arith.constant 0 : index
    %c0_6 = arith.constant 0 : index
    %19 = vector.load %arg3[%c0_5, %c0_6] : memref<76x8xbf16, #tpu.memory_space<vmem>>, vector<76x8xbf16>
    %cst = arith.constant dense<0.000000e+00> : vector<128x8xf32>
    %20 = tpu.matmul %18, %19, %cst {dimension_numbers = #tpu.dot_dimension_numbers<[1], [0], [0], [1], [0, 0, 1, 1], [], []>} : vector<128x76xbf16>, vector<76x8xbf16>, vector<128x8xf32> -> vector<128x8xf32>
    %c0_7 = arith.constant 0 : index
    %c0_8 = arith.constant 0 : index
    %21 = vector.load %arg4[%c0_7, %c0_8] : memref<1x8xf32, #tpu.memory_space<vmem>>, vector<1x8xf32>
    %22 = vector.broadcast %21 : vector<1x8xf32> to vector<128x8xf32>
    %23 = arith.addf %20, %22 : vector<128x8xf32>
    %24 = vector.shape_cast %23 : vector<128x8xf32> to vector<8x16x8xf32>
    %25 = vector.extract_strided_slice %24 {offsets = [0, 0, 0], sizes = [8, 8, 8], strides = [1, 1, 1]} : vector<8x16x8xf32> to vector<8x8x8xf32>
    %cst_9 = arith.constant 0.000000e+00 : f32
    %26 = vector.broadcast %cst_9 : f32 to vector<8x8x8xf32>
    %27 = arith.maximumf %25, %26 : vector<8x8x8xf32>
    %28 = vector.shape_cast %27 : vector<8x8x8xf32> to vector<1x8x8x8xf32>
    %29 = arith.truncf %28 : vector<1x8x8x8xf32> to vector<1x8x8x8xbf16>
    %c0_10 = arith.constant 0 : index
    %c0_11 = arith.constant 0 : index
    %c0_12 = arith.constant 0 : index
    %c0_13 = arith.constant 0 : index
    %30 = vector.load %arg6[%c0_10, %c0_11, %c0_12, %c0_13] : memref<1x8x8x8xbf16, #tpu.memory_space<vmem>>, vector<1x8x8x8xbf16>
    tpu.vector_store %arg6[%c0_10, %c0_11, %c0_12, %c0_13], %29 {strides = array<i32>} : memref<1x8x8x8xbf16, #tpu.memory_space<vmem>>, vector<1x8x8x8xbf16>,
    return
  }
  func.func @transform_0(%arg0: i32, %arg1: i32) -> (i32, i32, i32, i32) {
    %c0_i32 = arith.constant 0 : i32
    %c0_i32_0 = arith.constant 0 : i32
    %c0_i32_1 = arith.constant 0 : i32
    %c0_i32_2 = arith.constant 0 : i32
    return %arg0, %c0_i32, %c0_i32_0, %c0_i32_1 : i32, i32, i32, i32
  }
  func.func @transform_1(%arg0: i32, %arg1: i32) -> (i32, i32) {
    %c0_i32 = arith.constant 0 : i32
    %c0_i32_0 = arith.constant 0 : i32
    %c0_i32_1 = arith.constant 0 : i32
    return %c0_i32, %c0_i32_0 : i32, i32
  }
  func.func @transform_2(%arg0: i32, %arg1: i32) -> (i32, i32) {
    %c0_i32 = arith.constant 0 : i32
    %c0_i32_0 = arith.constant 0 : i32
    %c0_i32_1 = arith.constant 0 : i32
    return %c0_i32, %c0_i32_0 : i32, i32
  }
  func.func @transform_3(%arg0: i32, %arg1: i32) -> (i32, i32, i32, i32) {
    %c0_i32 = arith.constant 0 : i32
    %c0_i32_0 = arith.constant 0 : i32
    %c0_i32_1 = arith.constant 0 : i32
    %c0_i32_2 = arith.constant 0 : i32
    return %arg0, %c0_i32, %c0_i32_0, %c0_i32_1 : i32, i32, i32, i32
  }
  func.func @transform_4(%arg0: i32, %arg1: i32) -> (i32, i32, i32, i32) {
    %c0_i32 = arith.constant 0 : i32
    %c0_i32_0 = arith.constant 0 : i32
    %c0_i32_1 = arith.constant 0 : i32
    return %arg0, %arg1, %c0_i32, %c0_i32_0 : i32, i32, i32, i32
  }
}

</mosaic_0001>

<bundles_post_ra>
// kernel: basic_block_forward.2
= control target key start
LH: loop header
LB: loop body
LE: loop exit
PB: predicated region body
PF: predicated region fallthrough
CT: control target
= control target key end

     0   :  { %s1017_s12 = smov 0   ;;  %s1019_s13 = smov 0   ;;  %s1298_s0 = inlined_call_operand.vmem [shape: bf16[2,9,17,16], index: 0, kind: input, shape index: {}]   ;;  %s1299_s1 = inlined_call_operand.vmem [shape: bf16[36,8], index: 1, kind: input, shape index: {}]   ;;  %s1300_s2 = inlined_call_operand.vmem [shape: f32[1,8], index: 2, kind: input, shape index: {}]   ;;  %s1301_s3 = inlined_call_operand.vmem [shape: bf16[2,8,8,8], index: 3, kind: output, shape index: {}]  }
   0x1   :  { %s1021_s14 = smov 0  }
   0x2 LB: > { %s25_s15 = sadd.s32 1, %s986_s13  ;;  %p839_p0 = scmp.ge.s32.totalorder %s990_s14, 1  ;;  %s990_s14 = sphi %s1021_s14, %s13_s14   ;;  %s986_s13 = sphi %s1019_s13, %s1303_s13   ;;  %s982_s12 = sphi %s1017_s12, %s1302_s12  }
   0x3   : > { %p27_p1 = scmp.ge.s32.totalorder %s25_s15, 2  ;;  %p151_p2 = scmp.lt.s32.totalorder %s990_s14, 3 }
   0x5   : > { %s1305_s15 = smov (%p27_p1, %s25_s15), 0  ;;  %p152_p3 = pnand %p839_p0, %p151_p2 }
   0x6   : > { %p179_p4 = scmp.lt.s32.totalorder (!%p152_p3), %s982_s12, 1  ;;  %vm290_vm0 = vsmask.f32 (!%p152_p3), 7424  ;;  %s992_s20 = smov (!%p152_p3), 4   ;;  %v965_v41 = vld [vmem:[%s1299_s1] sm:$0xff] (!%p152_p3)   ;;  %v966_v44 = vld [vmem:[%s1299_s1 + $0x8] sm:$0xff] (!%p152_p3)  }
   0x7   : > { %155 = sbr.rel (%p152_p3) target bundleno = 431 (0x1af), region = 32  ;;  %s993_s21 = smov (!%p152_p3), 8   ;;  %887 = vmatprep.subr.bf16.mxu0 (!%p152_p3), %v965_v41  ;;  %909 = vmatprep.subr.bf16.mxu1 (!%p152_p3), %v965_v41  ;;  %v967_v49 = vld [vmem:[%s1299_s1 + $0x10] ss:$0 sps:$4 sm:$0x33] (!%p152_p3)   ;;  %vm634_vm1 = vcmask (!%p152_p3), 1041408  }
   0x8   : > { %s994_s22 = smov (!%p152_p3), 12   ;;  %888 = vmatpush3.bf16.msra.mxu0 (!%p152_p3), %v965_v41  ;;  %912 = vmatpush3.bf16.msra.mxu1 (!%p152_p3), %v965_v41  ;;  %s995_s29 = smov (!%p152_p3), 24   ;;  %v636_v58 = vsel (!%p152_p3), %vm634_vm1, %v967_v49, 0  ;;  %vm487_vm2 = vcmask (!%p152_p3), 64512   ;;  %vm504_vm3 = vcmask (!%p152_p3), 97280   ;;  %vm521_vm4 = vcmask (!%p152_p3), 130048  }
   0x9   : > { %889 = vmatprep.subr.bf16.mxu0 (!%p152_p3), %v966_v44  ;;  %910 = vmatprep.subr.bf16.mxu1 (!%p152_p3), %v966_v44  ;;  %s996_s30 = smov (!%p152_p3), 32   ;;  %vm530_vm5 = vcmask (!%p152_p3), 162816   ;;  %vm547_vm6 = vcmask (!%p152_p3), 195584   ;;  %vm564_vm7 = vcmask (!%p152_p3), 228352   ;;  %vm573_vm8 = vcmask (!%p152_p3), 261120  }
   0xa   : > { %vm617_vm9 = vcmask (!%p152_p3), 293888   ;;  %vm743_vm10 = vcmask (!%p152_p3), 60416  }
   0xc   : > { %890 = vmatpush3.bf16.msra.mxu0 (!%p152_p3), %v966_v44  ;;  %913 = vmatpush3.bf16.msra.mxu1 (!%p152_p3), %v966_v44 }
   0xd   : > { %915 = vmatprep.subr.msk.bf16.mxu0 (!%p152_p3), %vm634_vm1, %v967_v49  ;;  %916 = vmatprep.subr.msk.bf16.mxu1 (!%p152_p3), %vm634_vm1, %v967_v49 }
   0xe   : > { %s1307_s12 = smov (!%p179_p4, %s982_s12), 1 }
   0xf   : > { %s917_s16 = smul.u32 108, %s1307_s12  ;;  %s875_s6 = sshll.u32 %s1307_s12, 5 }
  0x10   : > { %892 = vmatpush3.bf16.msra.mxu0 %v636_v58  ;;  %914 = vmatpush3.bf16.msra.mxu1 %v636_v58  ;;  %s1271_s9 = scalar_lea.vmem %s1301_s3, %s875_s6 }
  0x11   : > { %s1041_s19 = scalar_lea.vmem %s1298_s0, %s917_s16 }
  0x12   : > { %v1044_v0 = vld [vmem:[%s1041_s19 + $0x30] sm:$0xff]   ;;  %v1047_v1 = vld [vmem:[%s1041_s19] sm:$0xff]   ;;  %v952_v11 = vld [vmem:[%s1041_s19 + $0x8] ss:$0 sps:$4 sm:$0x11]  }
  0x13   : > { %411 = vrot.lane.b32.xlu1 %v1044_v0, %s992_s20  ;;  %v1052_v2 = vld [vmem:[%s1041_s19 + $0x3c] sm:$0xff]   ;;  %v340_v3 = vshrl.u32 %v1044_v0, 16  ;;  %403 = vrot.lane.b32.xlu0 %v1047_v1, %s992_s20  ;;  %v1058_v4 = vld [vmem:[%s1041_s19 + $0xc] sm:$0xff]   ;;  %v292_v5 = vshrl.u32 %v1047_v1, 16  ;;  %v294_v7 = vshll.u32 %v1047_v1, 16  ;;  %v342_v17 = vshll.u32 %v1044_v0, 16 }
  0x14   : > { %v951_v6 = vld [vmem:[%s1041_s19 + $0x14] ss:$0 sps:$4 sm:$0x11]   ;;  %v304_v8 = vshrl.u32 %v1058_v4, 16  ;;  %v306_v9 = vshll.u32 %v1058_v4, 16  ;;  %v352_v13 = vshrl.u32 %v1052_v2, 16 }
  0x15   : > { %v311_v10 = vshll.u32 %v951_v6, 16  ;;  %v296_v12 = vrot.slane %v294_v7, 1  ;;  %v953_v15 = vld [vmem:[%s1041_s19 + $0x44] ss:$0 sps:$4 sm:$0x11]   ;;  %v354_v16 = vshll.u32 %v1052_v2, 16 }
  0x16   : > { %v308_v14 = vrot.slane %v306_v9, 1  ;;  %v299_v20 = vshll.u32 %v952_v11, 16  ;;  %v359_v23 = vshll.u32 %v953_v15, 16  ;;  %v954_v24 = vld [vmem:[%s1041_s19 + $0x38] ss:$0 sps:$4 sm:$0x11]  }
  0x17   : > { %413 = vrot.lane.b32.xlu1 %v1052_v2, %s992_s20  ;;  %405 = vrot.lane.b32.xlu0 %v1058_v4, %s992_s20  ;;  %v313_v18 = vrot.slane %v311_v10, 1  ;;  %v297_v19 = vor.u32 %v296_v12, %v292_v5  ;;  %v356_v22 = vrot.slane %v354_v16, 1  ;;  %v344_v25 = vrot.slane %v342_v17, 1  ;;  %v1093_v36 = vld [vmem:[%s1041_s19 + $0x60] sm:$0xff]   ;;  %v1101_v39 = vld [vmem:[%s1041_s19 + $0x48] sm:$0xff]  }
  0x18   : > { %v309_v21 = vor.u32 %v308_v14, %v304_v8  ;;  %v301_v26 = vrot.slane %v299_v20, 1  ;;  %v361_v29 = vrot.slane %v359_v23, 1  ;;  %v347_v32 = vshll.u32 %v954_v24, 16  ;;  %v1107_v42 = vld [vmem:[%s1041_s19 + $0x18] sm:$0xff]   ;;  %v1138_v62 = vld [vmem:[%s1041_s19 + $0x24] sm:$0xff]  }
  0x19   : > { %v357_v28 = vor.u32 %v356_v22, %v352_v13  ;;  %v345_v31 = vor.u32 %v344_v25, %v340_v3  ;;  %v462_v37 = vshll.u32 %v1093_v36, 16  ;;  %v460_v38 = vshrl.u32 %v1093_v36, 16  ;;  %v964_v43 = vld [vmem:[%s1041_s19 + $0x68] ss:$0 sps:$4 sm:$0x11]   ;;  %v1133_v57 = vld [vmem:[%s1041_s19 + $0x54] sm:$0xff]  }
  0x1a   : > { %v1076_v27 = vsel %vm290_vm0, %v309_v21, %v313_v18  ;;  %v302_v30 = vsel %vm290_vm0, %v297_v19, %v301_v26  ;;  %v349_v34 = vrot.slane %v347_v32, 1  ;;  %v957_v45 = vld [vmem:[%s1041_s19 + $0x50] ss:$0 sps:$4 sm:$0x11]   ;;  %v467_v47 = vshll.u32 %v964_v43, 16 }
  0x1b   : > { %389 = vrot.lane.b32.xlu1 %v1076_v27, %s993_s21  ;;  %387 = vrot.lane.b32.xlu0 %v302_v30, %s993_s21  ;;  %v1083_v33 = vsel %vm290_vm0, %v357_v28, %v361_v29  ;;  %v464_v40 = vrot.slane %v462_v37, 1  ;;  %v366_v48 = vshll.u32 %v1101_v39, 16  ;;  %v958_v50 = vld [vmem:[%s1041_s19 + $0x20] ss:$0 sps:$4 sm:$0x11]   ;;  %v318_v51 = vshll.u32 %v1107_v42, 16 }
  0x1c   : > { %v1088_v35 = vsel %vm290_vm0, %v345_v31, %v349_v34  ;;  %v469_v52 = vrot.slane %v467_v47, 1  ;;  %v364_v54 = vshrl.u32 %v1101_v39, 16  ;;  %v371_v56 = vshll.u32 %v957_v45, 16  ;;  %v960_v5 = vld [vmem:[%s1041_s19 + $0x5c] ss:$0 sps:$4 sm:$0x11]  }
  0x1d   : > { %v465_v46 = vor.u32 %v464_v40, %v460_v38  ;;  %v368_v55 = vrot.slane %v366_v48, 1  ;;  %v316_v59 = vshrl.u32 %v1107_v42, 16  ;;  %v320_v60 = vrot.slane %v318_v51, 1  ;;  %v962_v9 = vld [vmem:[%s1041_s19 + $0x2c] ss:$0 sps:$4 sm:$0x11]  }
  0x1e   : > { %v323_v61 = vshll.u32 %v958_v50, 16  ;;  %v373_v3 = vrot.slane %v371_v56, 1  ;;  %v378_v6 = vshll.u32 %v1133_v57, 16  ;;  %v330_v10 = vshll.u32 %v1138_v62, 16 }
  0x1f   : > { %397 = vrot.lane.b32.xlu1 %v1083_v33, %s993_s21  ;;  %395 = vrot.lane.b32.xlu0 %v1088_v35, %s993_s21  ;;  %v1127_v53 = vsel %vm290_vm0, %v465_v46, %v469_v52  ;;  %v369_v63 = vor.u32 %v368_v55, %v364_v54  ;;  %v321_v7 = vor.u32 %v320_v60, %v316_v59  ;;  %v376_v12 = vshrl.u32 %v1133_v57, 16 }
  0x20   : > { %v325_v8 = vrot.slane %v323_v61, 1  ;;  %v380_v13 = vrot.slane %v378_v6, 1  ;;  %v383_v14 = vshll.u32 %v960_v5, 16  ;;  %v328_v16 = vshrl.u32 %v1138_v62, 16 }
  0x21   : > { %v374_v11 = vsel %vm290_vm0, %v369_v63, %v373_v3  ;;  %v332_v17 = vrot.slane %v330_v10, 1  ;;  %v335_v18 = vshll.u32 %v962_v9, 16 }
  0x22   : > { %v326_v15 = vsel %vm290_vm0, %v321_v7, %v325_v8  ;;  %v381_v19 = vor.u32 %v380_v13, %v376_v12  ;;  %v385_v20 = vrot.slane %v383_v14, 1 }
  0x23   : > { %427 = vrot.lane.b32.xlu1 %v1088_v35, %s994_s22  ;;  %419 = vrot.lane.b32.xlu0 %v302_v30, %s994_s22  ;;  %v333_v21 = vor.u32 %v332_v17, %v328_v16  ;;  %v337_v22 = vrot.slane %v335_v18, 1 }
  0x24   : > { %v386_v23 = vsel %vm290_vm0, %v381_v19, %v385_v20 }
  0x25   : > { %v338_v24 = vsel %vm290_vm0, %v333_v21, %v337_v22 }
  0x27   : > { %429 = vrot.lane.b32.xlu1 %v1083_v33, %s994_s22  ;;  %421 = vrot.lane.b32.xlu0 %v1076_v27, %s994_s22 }
  0x2b   : > { %448 = vrot.lane.b32.xlu1 %v1052_v2, %s995_s29  ;;  %440 = vrot.lane.b32.xlu0 %v1058_v4, %s995_s29 }
  0x2f   : > { %450 = vrot.lane.b32.xlu1 %v1101_v39, %s995_s29  ;;  %442 = vrot.lane.b32.xlu0 %v1107_v42, %s995_s29 }
  0x33   : > { %479 = vrot.lane.b32.xlu1 %v1083_v33, %s996_s30  ;;  %471 = vrot.lane.b32.xlu0 %v1076_v27, %s996_s30 }
  0x37   : > { %481 = vrot.lane.b32.xlu1 %v374_v11, %s996_s30  ;;  %473 = vrot.lane.b32.xlu0 %v326_v15, %s996_s30 }
  0x3b   : > { %399 = vrot.lane.b32.xlu1 %v374_v11, %s993_s21  ;;  %391 = vrot.lane.b32.xlu0 %v326_v15, %s993_s21 }
  0x3f   : > { %401 = vrot.lane.b32.xlu1 %v386_v23, %s993_s21  ;;  %393 = vrot.lane.b32.xlu0 %v338_v24, %s993_s21 }
  0x43   : > { %415 = vrot.lane.b32.xlu1 %v1101_v39, %s992_s20  ;;  %407 = vrot.lane.b32.xlu0 %v1107_v42, %s992_s20 }
  0x47   : > { %417 = vrot.lane.b32.xlu1 %v1133_v57, %s992_s20  ;;  %409 = vrot.lane.b32.xlu0 %v1138_v62, %s992_s20 }
  0x4b   : > { %431 = vrot.lane.b32.xlu1 %v374_v11, %s994_s22  ;;  %423 = vrot.lane.b32.xlu0 %v326_v15, %s994_s22 }
  0x4f   : > { %433 = vrot.lane.b32.xlu1 %v386_v23, %s994_s22  ;;  %425 = vrot.lane.b32.xlu0 %v338_v24, %s994_s22 }
  0x53   : > { %452 = vrot.lane.b32.xlu1 %v1133_v57, %s995_s29  ;;  %444 = vrot.lane.b32.xlu0 %v1138_v62, %s995_s29 }
  0x57   : > { %454 = vrot.lane.b32.xlu1 %v1093_v36, %s995_s29  ;;  %446 = vrot.lane.b32.xlu0 %v1044_v0, %s995_s29 }
  0x5b   : > { %483 = vrot.lane.b32.xlu1 %v386_v23, %s996_s30  ;;  %475 = vrot.lane.b32.xlu0 %v338_v24, %s996_s30 }
  0x5f   : > { %485 = vrot.lane.b32.xlu1 %v1127_v53, %s996_s30  ;;  %477 = vrot.lane.b32.xlu0 %v1088_v35, %s996_s30 }
  0x85   : > { %v412_v25 = vpop.permute.xlu1 %411  ;;  %v404_v26 = vpop.permute.xlu0 %403 }
  0x89   : > { %v414_v27 = vpop.permute.xlu1 %413  ;;  %v406_v28 = vpop.permute.xlu0 %405 }
  0x8d   : > { %v390_v29 = vpop.permute.xlu1 %389  ;;  %v388_v30 = vpop.permute.xlu0 %387 }
  0x8e   : > { %v489_v35 = vsel %vm487_vm2, %v1047_v1, %v388_v30 }
  0x8f   : > { %v506_v43 = vsel %vm504_vm3, %v489_v35, %v404_v26 }
  0x90   : > { %v522_v48 = vsel %vm521_vm4, %v506_v43, %v404_v26 }
  0x91   : > { %v398_v31 = vpop.permute.xlu1 %397  ;;  %v396_v32 = vpop.permute.xlu0 %395 }
  0x92   : > { %v497_v36 = vsel %vm487_vm2, %v1044_v0, %v396_v32  ;;  %v499_v44 = vsel %vm487_vm2, %v1052_v2, %v398_v31  ;;  %v491_v0 = vsel %vm487_vm2, %v1058_v4, %v390_v29 }
  0x93   : > { %v514_v40 = vsel %vm504_vm3, %v497_v36, %v412_v25  ;;  %v516_v47 = vsel %vm504_vm3, %v499_v44, %v414_v27  ;;  %v508_v50 = vsel %vm504_vm3, %v491_v0, %v406_v28 }
  0x94   : > { %v526_v45 = vsel %vm521_vm4, %v514_v40, %v412_v25  ;;  %v527_v4 = vsel %vm521_vm4, %v516_v47, %v414_v27  ;;  %v523_v55 = vsel %vm521_vm4, %v508_v50, %v406_v28 }
  0x95   : > { %v428_v33 = vpop.permute.xlu1 %427  ;;  %v420_v34 = vpop.permute.xlu0 %419 }
  0x96   : > { %v540_v1 = vsel %vm530_vm5, %v526_v45, %v428_v33  ;;  %v532_v51 = vsel %vm530_vm5, %v522_v48, %v420_v34 }
  0x99   : > { %v430_v37 = vpop.permute.xlu1 %429  ;;  %v422_v38 = vpop.permute.xlu0 %421 }
  0x9a   : > { %v542_v54 = vsel %vm530_vm5, %v527_v4, %v430_v37  ;;  %v534_v59 = vsel %vm530_vm5, %v523_v55, %v422_v38  ;;  %v861_v55 = vld [vmem:[%s1300_s2] ss:$0 sm:$0xff] }
  0x9d   : > { %v449_v41 = vpop.permute.xlu1 %448  ;;  %v441_v46 = vpop.permute.xlu0 %440 }
  0x9e   : > { %v557_v2 = vsel %vm547_vm6, %v540_v1, %v449_v41  ;;  %v549_v53 = vsel %vm547_vm6, %v532_v51, %v441_v46 }
  0x9f   : > { %v569_v56 = vsel %vm564_vm7, %v557_v2, %v449_v41  ;;  %v565_v60 = vsel %vm564_vm7, %v549_v53, %v441_v46 }
  0xa1   : > { %v451_v49 = vpop.permute.xlu1 %450  ;;  %v443_v52 = vpop.permute.xlu0 %442 }
  0xa2   : > { %v559_v61 = vsel %vm547_vm6, %v542_v54, %v451_v49  ;;  %v551_v5 = vsel %vm547_vm6, %v534_v59, %v443_v52 }
  0xa3   : > { %v570_v7 = vsel %vm564_vm7, %v559_v61, %v451_v49  ;;  %v566_v9 = vsel %vm564_vm7, %v551_v5, %v443_v52 }
  0xa5   : > { %v480_v58 = vpop.permute.xlu1 %479  ;;  %v472_v63 = vpop.permute.xlu0 %471 }
  0xa6   : > { %v583_v3 = vsel %vm573_vm8, %v569_v56, %v480_v58  ;;  %v575_v6 = vsel %vm573_vm8, %v565_v60, %v472_v63 }
  0xa7   : > { %901 = vmatprep.mubr.msk.bf16.mxu1 %vm617_vm9, %v583_v3  ;;  %893 = vmatprep.mubr.msk.bf16.mxu0 %vm617_vm9, %v575_v6 }
  0xa9   : > { %v482_v8 = vpop.permute.xlu1 %481  ;;  %v474_v11 = vpop.permute.xlu0 %473 }
  0xaa   : > { %v585_v10 = vsel %vm573_vm8, %v570_v7, %v482_v8  ;;  %v577_v12 = vsel %vm573_vm8, %v566_v9, %v474_v11 }
  0xab   : > { %902 = vmatmul.mubr.msk.bf16.vlgmr.msra.gmra.mrb[0].mxu1 %vm617_vm9, %v585_v10  ;;  %894 = vmatmul.mubr.msk.bf16.vlgmr.msra.gmra.mrb[0].mxu0 %vm617_vm9, %v577_v12 }
  0xad   : > { %v400_v13 = vpop.permute.xlu1 %399  ;;  %v392_v14 = vpop.permute.xlu0 %391 }
  0xae   : > { %v501_v25 = vsel %vm487_vm2, %v1101_v39, %v400_v13  ;;  %v493_v26 = vsel %vm487_vm2, %v1107_v42, %v392_v14 }
  0xb1   : > { %v402_v15 = vpop.permute.xlu1 %401  ;;  %v394_v16 = vpop.permute.xlu0 %393 }
  0xb2   : > { %v503_v31 = vsel %vm487_vm2, %v1133_v57, %v402_v15  ;;  %v495_v33 = vsel %vm487_vm2, %v1138_v62, %v394_v16 }
  0xb5   : > { %v416_v17 = vpop.permute.xlu1 %415  ;;  %v408_v18 = vpop.permute.xlu0 %407 }
  0xb6   : > { %v518_v27 = vsel %vm504_vm3, %v501_v25, %v416_v17  ;;  %v510_v29 = vsel %vm504_vm3, %v493_v26, %v408_v18 }
  0xb7   : > { %v528_v32 = vsel %vm521_vm4, %v518_v27, %v416_v17  ;;  %v524_v34 = vsel %vm521_vm4, %v510_v29, %v408_v18 }
  0xb9   : > { %v418_v19 = vpop.permute.xlu1 %417  ;;  %v410_v20 = vpop.permute.xlu0 %409 }
  0xba   : > { %v520_v39 = vsel %vm504_vm3, %v503_v31, %v418_v19  ;;  %v512_v37 = vsel %vm504_vm3, %v495_v33, %v410_v20 }
  0xbb   : > { %v529_v41 = vsel %vm521_vm4, %v520_v39, %v418_v19  ;;  %v525_v62 = vsel %vm521_vm4, %v512_v37, %v410_v20 }
  0xbd   : > { %v432_v21 = vpop.permute.xlu1 %431  ;;  %v424_v22 = vpop.permute.xlu0 %423 }
  0xbe   : > { %v544_v42 = vsel %vm530_vm5, %v528_v32, %v432_v21  ;;  %v536_v38 = vsel %vm530_vm5, %v524_v34, %v424_v22 }
  0xc1   : > { %v434_v23 = vpop.permute.xlu1 %433  ;;  %v426_v24 = vpop.permute.xlu0 %425 }
  0xc2   : > { %v546_v43 = vsel %vm530_vm5, %v529_v41, %v434_v23  ;;  %v538_v46 = vsel %vm530_vm5, %v525_v62, %v426_v24 }
  0xc5   : > { %v453_v28 = vpop.permute.xlu1 %452  ;;  %v445_v30 = vpop.permute.xlu0 %444 }
  0xc6   : > { %v561_v35 = vsel %vm547_vm6, %v544_v42, %v453_v28  ;;  %v553_v57 = vsel %vm547_vm6, %v536_v38, %v445_v30 }
  0xc7   : > { %v571_v44 = vsel %vm564_vm7, %v561_v35, %v453_v28  ;;  %v567_v0 = vsel %vm564_vm7, %v553_v57, %v445_v30 }
  0xc9   : > { %v455_v36 = vpop.permute.xlu1 %454  ;;  %v447_v40 = vpop.permute.xlu0 %446 }
  0xca   : > { %v563_v47 = vsel %vm547_vm6, %v546_v43, %v455_v36  ;;  %v555_v49 = vsel %vm547_vm6, %v538_v46, %v447_v40 }
  0xcb   : > { %v572_v51 = vsel %vm564_vm7, %v563_v47, %v455_v36  ;;  %v568_v52 = vsel %vm564_vm7, %v555_v49, %v447_v40 }
  0xcd   : > { %v484_v45 = vpop.permute.xlu1 %483  ;;  %v476_v48 = vpop.permute.xlu0 %475 }
  0xce   : > { %v587_v1 = vsel %vm573_vm8, %v571_v44, %v484_v45  ;;  %v579_v50 = vsel %vm573_vm8, %v567_v0, %v476_v48 }
  0xcf   : > { %905 = vmatprep.mubr.msk.bf16.mxu1 %vm617_vm9, %v587_v1  ;;  %897 = vmatprep.mubr.msk.bf16.mxu0 %vm617_vm9, %v579_v50 }
  0xd1   : > { %v486_v2 = vpop.permute.xlu1 %485  ;;  %v478_v4 = vpop.permute.xlu0 %477 }
  0xd2   : > { %v589_v53 = vsel %vm573_vm8, %v572_v51, %v486_v2  ;;  %v581_v54 = vsel %vm573_vm8, %v568_v52, %v478_v4 }
  0xd3   : > { %906 = vmatmul.mubr.msk.bf16.gmra.mrb[4].mxu1 %vm617_vm9, %v589_v53  ;;  %898 = vmatmul.mubr.msk.bf16.gmra.mrb[4].mxu0 %vm617_vm9, %v581_v54 }
 0x17e   : > { %v903_v56 = vpop.f32.mrb[0].mxu1  ;;  %v895_v58 = vpop.f32.mrb[0].mxu0 }
 0x17f   : > { %v708_v59 = vadd.f32 %v903_v56, %v861_v55  ;;  %v700_v60 = vpop.f32.mrb[1].mxu1  ;;  %v680_v61 = vadd.f32 %v895_v58, %v861_v55  ;;  %v672_v63 = vpop.f32.mrb[1].mxu0 }
 0x180   : > { %v701_v3 = vadd.f32 %v861_v55, %v700_v60  ;;  %v904_v5 = vpop.f32.mrb[2].mxu1  ;;  %v673_v7 = vadd.f32 %v861_v55, %v672_v63  ;;  %v896_v8 = vpop.f32.mrb[2].mxu0 }
 0x181   : > { %v732_v6 = vmax.f32 %v708_v59, 0.0  ;;  %v703_v9 = vpop.f32.mrb[3].mxu1  ;;  %v728_v10 = vmax.f32 %v680_v61, 0.0  ;;  %v675_v12 = vpop.f32.mrb[3].mxu0 }
 0x182   : > { %v731_v11 = vmax.f32 %v701_v3, 0.0  ;;  %v727_v14 = vmax.f32 %v673_v7, 0.0 }
 0x183   : > { %v740_v13 = vpack.c.bf16 %v732_v6, %v732_v6  ;;  %v736_v15 = vpack.c.bf16 %v728_v10, %v728_v10 }
 0x184   : > { %v739_v16 = vpack.c.bf16 %v731_v11, %v731_v11  ;;  %v735_v17 = vpack.c.bf16 %v727_v14, %v727_v14 }
 0x185   : > { %749 = vst.msk [vmem:[%s1271_s9 + $0x14] sm:$0xf] %vm743_vm10, %v740_v13  ;;  %745 = vst.msk [vmem:[%s1271_s9 + $0x4] sm:$0xf] %vm743_vm10, %v736_v15 }
 0x186   : > { %748 = vst.msk [vmem:[%s1271_s9 + $0x10] sm:$0xf] %vm743_vm10, %v739_v16  ;;  %744 = vst.msk [vmem:[%s1271_s9] sm:$0xf] %vm743_vm10, %v735_v17 }
 0x1a6   : > { %v907_v18 = vpop.f32.mrb[4].mxu1  ;;  %v899_v19 = vpop.f32.mrb[4].mxu0 }
 0x1a7   : > { %v722_v20 = vadd.f32 %v907_v18, %v861_v55  ;;  %v714_v21 = vpop.f32.mrb[5].mxu1  ;;  %v694_v22 = vadd.f32 %v899_v19, %v861_v55  ;;  %v686_v23 = vpop.f32.mrb[5].mxu0 }
 0x1a8   : > { %v715_v24 = vadd.f32 %v861_v55, %v714_v21  ;;  %v908_v25 = vpop.f32.mrb[6].mxu1  ;;  %v687_v27 = vadd.f32 %v861_v55, %v686_v23  ;;  %v900_v28 = vpop.f32.mrb[6].mxu0 }
 0x1a9   : > { %v734_v26 = vmax.f32 %v722_v20, 0.0  ;;  %v717_v29 = vpop.f32.mrb[7].mxu1  ;;  %v730_v30 = vmax.f32 %v694_v22, 0.0  ;;  %v689_v32 = vpop.f32.mrb[7].mxu0 }
 0x1aa   : > { %v733_v31 = vmax.f32 %v715_v24, 0.0  ;;  %v729_v34 = vmax.f32 %v687_v27, 0.0 }
 0x1ab   : > { %v742_v33 = vpack.c.bf16 %v734_v26, %v734_v26  ;;  %v738_v39 = vpack.c.bf16 %v730_v30, %v730_v30 }
 0x1ac   : > { %v741_v42 = vpack.c.bf16 %v733_v31, %v733_v31  ;;  %v737_v36 = vpack.c.bf16 %v729_v34, %v729_v34 }
 0x1ad   : > { %751 = vst.msk [vmem:[%s1271_s9 + $0x1c] sm:$0xf] %vm743_vm10, %v742_v33  ;;  %747 = vst.msk [vmem:[%s1271_s9 + $0xc] sm:$0xf] %vm743_vm10, %v738_v39 }
 0x1ae   : > { %750 = vst.msk [vmem:[%s1271_s9 + $0x18] sm:$0xf] %vm743_vm10, %v741_v42  ;;  %746 = vst.msk [vmem:[%s1271_s9 + $0x8] sm:$0xf] %vm743_vm10, %v737_v36 }
 0x1af PF: > { %s13_s14 = sadd.s32 1, %s990_s14   ;;  %s1302_s12 = smov %s986_s13 }
 0x1b0   : > { %p10_p5 = scmp.ge.s32.totalorder %s13_s14, 4   ;;  %s1303_s13 = smov %s1305_s15 }
 0x1b2   :  { %12 = sbr.rel (!%p10_p5) target bundleno = 2 (0x2), region = 63 }

// kernel: basic_block_forward.3
= control target key start
LH: loop header
LB: loop body
LE: loop exit
PB: predicated region body
PF: predicated region fallthrough
CT: control target
= control target key end

     0   :  { %9 = vsyncpa [#allocation3], 0  ;;  %s2006_s0 = inlined_call_operand.vmem [shape: bf16[2,10,18,8], index: 0, kind: input, shape index: {}]   ;;  %s2007_s1 = inlined_call_operand.vmem [shape: bf16[76,8], index: 1, kind: input, shape index: {}]   ;;  %s2008_s2 = inlined_call_operand.vmem [shape: f32[1,8], index: 2, kind: input, shape index: {}]   ;;  %s2009_s3 = inlined_call_operand.vmem [shape: bf16[2,8,16,4], index: 3, kind: input, shape index: {}]   ;;  %s2010_s4 = inlined_call_operand.hbm [shape: bf16[2,8,8,8], index: 4, kind: output, shape index: {}]  }
   0x1   :  { %11 = vsyncpa [#allocation3 + $0x1], 0  ;;  %s1464_s15 = smov 0   ;;  %s1466_s16 = smov 0  }
   0x2   :  { %s1468_s17 = smov 0   ;;  %s1470_s18 = smov 0  }
   0x3   :  { %s1472_s19 = smov 0   ;;  %s1474_s20 = smov 0  }
   0x4 LB: > { %s1140_s21 = sadd.s32 4294967295, %s1426_s20   ;;  %s1141_s22 = sadd.s32 4294967294, %s1426_s20   ;;  %s1426_s20 = sphi %s1474_s20, %s17_s20   ;;  %s1422_s19 = sphi %s1472_s19, %s2017_s19   ;;  %s1418_s18 = sphi %s1470_s18, %s2016_s18   ;;  %s1414_s17 = sphi %s1468_s17, %s2015_s17   ;;  %s1410_s16 = sphi %s1466_s16, %s2014_s16   ;;  %s1406_s15 = sphi %s1464_s15, %s2013_s15  }
   0x5   : > { %s29_s23 = sadd.s32 1, %s1422_s19  ;;  %s132_s24 = sadd.s32 1, %s1414_s17 }
   0x6   : > { %p31_p0 = scmp.ge.s32.totalorder %s29_s23, 2  ;;  %p142_p1 = scmp.ne.s32.totalorder %s1414_s17, %s1410_s16 }
   0x7   : > { %p143_p2 = scmp.eq.s32.totalorder %s1140_s21, 1  ;;  %p148_p3 = scmp.ne.s32.totalorder %s1410_s16, %s1406_s15 }
   0x8   : > { %s2019_s23 = smov (%p31_p0, %s29_s23), 0  ;;  %p149_p5 = scmp.eq.s32.totalorder %s1141_s22, 1 }
   0x9   : > { %p1504_p4 = por %p143_p2, %p142_p1  ;;  %s127_s26 = ssub.s32 %s1422_s19, %s2019_s23 }
   0xa   : > { %p1144_p6 = scmp.ge.s32.totalorder %s1426_s20, 1  ;;  %p130_p7 = scmp.eq.s32.totalorder %s127_s26, 0 }
   0xb   : > { %p1511_p8 = por %p149_p5, %p148_p3  ;;  %p189_p9 = scmp.lt.s32.totalorder %s1426_s20, 3 }
   0xc   : > { %s1517_s28 = scalar_select %p130_p7, %s1414_s17, %s132_s24  }
   0xd   : > { %p190_p10 = pnand %p1144_p6, %p189_p9 }
   0xe   : > { %p220_p11 = scmp.lt.s32.totalorder (!%p190_p10), %s1418_s18, 1  ;;  %vm462_vm0 = vcmask (!%p190_p10), 1046528   ;;  %s1428_s8 = smov (!%p190_p10), 24   ;;  %vm349_vm1 = vsmask.f32 (!%p190_p10), 7424  ;;  %vm917_vm2 = vcmask (!%p190_p10), 1045504  }
   0xf   : > { %193 = sbr.rel (%p190_p10) target bundleno = 519 (0x207), region = 36  ;;  %s1429_s9 = smov (!%p190_p10), 16   ;;  %vm701_vm3 = vcmask (!%p190_p10), 64512   ;;  %vm718_vm4 = vcmask (!%p190_p10), 130048   ;;  %vm752_vm5 = vcmask (!%p190_p10), 261120   ;;  %vm735_vm6 = vcmask (!%p190_p10), 195584  }
  0x10   : > { %s1430_s10 = smov (!%p190_p10), 8   ;;  %s1431_s21 = smov (!%p190_p10), 32   ;;  %vm769_vm7 = vcmask (!%p190_p10), 326656   ;;  %vm786_vm8 = vcmask (!%p190_p10), 392192   ;;  %vm803_vm9 = vcmask (!%p190_p10), 457728   ;;  %vm820_vm10 = vcmask (!%p190_p10), 523264  }
  0x11   : > { %s1432_s22 = smov (!%p190_p10), 40   ;;  %s1433_s24 = smov (!%p190_p10), 48   ;;  %vm837_vm11 = vcmask (!%p190_p10), 588800   ;;  %vm900_vm12 = vcmask (!%p190_p10), 621568   ;;  %vm1026_vm13 = vcmask (!%p190_p10), 60416  }
  0x12   : > { %s1434_s26 = smov (!%p190_p10), 56   ;;  %s1436_s6 = smov (!%p190_p10), 72  }
  0x16   : > { %s1521_s29 = scalar_select %p220_p11, %s1418_s18, 1 }
  0x18   : > { %s1249_s30 = smul.u32 120, %s1521_s29  ;;  %s1196_s11 = sshll.u32 %s1521_s29, 6 }
  0x19   : > { %s1611_s14 = scalar_lea.vmem %s2009_s3, %s1196_s11  ;;  %s1437_s29 = smov [#allocation2]  }
  0x1a   : > { %s1527_s7 = scalar_lea.vmem %s2006_s0, %s1249_s30  ;;  %s1352_s30 = sshll.u32 %s1437_s29, 4  ;;  %s1353_s30 = int_to_ptr.vmem [resolvable:$false] %s1352_s30 }
  0x1b   : > { %v1530_v0 = vld [vmem:[%s1527_s7 + $0x3c] sm:$0xff]   ;;  %v1533_v1 = vld [vmem:[%s1527_s7 + $0xc] sm:$0xff]   ;;  %v1318_v3 = vld [vmem:[%s1527_s7 + $0x38] ss:$0 sps:$4 sm:$0x11]   ;;  %s1354_s5 = scalar_lea.vmem %s1353_s30, 1024 }
  0x1c   : > { %516 = vrot.lane.b32.xlu1 %v1530_v0, %s1428_s8  ;;  %508 = vrot.lane.b32.xlu0 %v1533_v1, %s1428_s8  ;;  %v1540_v2 = vld [vmem:[%s1527_s7 + $0x30] sm:$0xff]   ;;  %v1544_v4 = vld [vmem:[%s1527_s7] sm:$0xff]   ;;  %v478_v5 = vrot.slane %v1530_v0, 1  ;;  %v476_v7 = vrot.slane %v1318_v3, 1  ;;  %v466_v9 = vrot.slane %v1533_v1, 1  ;;  %v363_v16 = vshrl.u32 %v1533_v1, 16 }
  0x1d   : > { %v475_v6 = vrot.slane %v1540_v2, 1  ;;  %v1320_v8 = vld [vmem:[%s1527_s7 + $0x8] ss:$0 sps:$4 sm:$0x11]   ;;  %v463_v10 = vrot.slane %v1544_v4, 1  ;;  %v365_v17 = vshll.u32 %v1533_v1, 16 }
  0x1e   : > { %v1321_v11 = vld [vmem:[%s1527_s7 + $0x44] ss:$0 sps:$4 sm:$0x11]   ;;  %v464_v13 = vrot.slane %v1320_v8, 1  ;;  %v351_v18 = vshrl.u32 %v1544_v4, 16  ;;  %v353_v22 = vshll.u32 %v1544_v4, 16 }
  0x1f   : > { %v1553_v12 = vsel %vm462_vm0, %v475_v6, %v476_v7  ;;  %v1322_v14 = vld [vmem:[%s1527_s7 + $0x14] ss:$0 sps:$4 sm:$0x11]   ;;  %v479_v15 = vrot.slane %v1321_v11, 1  ;;  %v367_v24 = vrot.slane %v365_v17, 1  ;;  %v358_v25 = vshll.u32 %v1320_v8, 16 }
  0x20   : > { %495 = vrot.lane.b32.xlu1 %v1553_v12, %s1429_s9  ;;  %v465_v19 = vsel %vm462_vm0, %v463_v10, %v464_v13  ;;  %v467_v20 = vrot.slane %v1322_v14, 1  ;;  %v370_v21 = vshll.u32 %v1322_v14, 16  ;;  %v411_v26 = vshrl.u32 %v1530_v0, 16  ;;  %v1577_v39 = vld [vmem:[%s1527_s7 + $0x48] sm:$0xff]   ;;  %v1583_v42 = vld [vmem:[%s1527_s7 + $0x18] sm:$0xff]   ;;  %v1617_v60 = vld [vmem:[%s1527_s7 + $0x60] sm:$0xff]  }
  0x21   : > { %487 = vrot.lane.b32.xlu0 %v465_v19, %s1429_s9  ;;  %v1565_v23 = vsel %vm462_vm0, %v478_v5, %v479_v15  ;;  %v355_v29 = vrot.slane %v353_v22, 1  ;;  %v413_v30 = vshll.u32 %v1530_v0, 16  ;;  %v368_v31 = vor.u32 %v367_v24, %v363_v16  ;;  %v1587_v47 = vld [vmem:[%s1527_s7 + $0x50] ss:$0 sps:$4 sm:$0x11]  }
  0x22   : > { %v1569_v27 = vsel %vm462_vm0, %v466_v9, %v467_v20  ;;  %v372_v28 = vrot.slane %v370_v21, 1  ;;  %v360_v32 = vrot.slane %v358_v25, 1  ;;  %v418_v33 = vshll.u32 %v1321_v11, 16  ;;  %v1591_v48 = vld [vmem:[%s1527_s7 + $0x20] ss:$0 sps:$4 sm:$0x11]  }
  0x23   : > { %v399_v34 = vshrl.u32 %v1540_v2, 16  ;;  %v356_v35 = vor.u32 %v355_v29, %v351_v18  ;;  %v415_v36 = vrot.slane %v413_v30, 1  ;;  %v401_v37 = vshll.u32 %v1540_v2, 16  ;;  %v1336_v8 = vld [vmem:[%s1527_s7 + $0x68] ss:$0 sps:$4 sm:$0x11]  }
  0x24   : > { %497 = vrot.lane.b32.xlu1 %v1565_v23, %s1429_s9  ;;  %v406_v38 = vshll.u32 %v1318_v3, 16  ;;  %v373_v40 = vsel %vm349_vm1, %v368_v31, %v372_v28  ;;  %v420_v41 = vrot.slane %v418_v33, 1  ;;  %v425_v51 = vshll.u32 %v1577_v39, 16  ;;  %v1630_v9 = vld [vmem:[%s1527_s7 + $0x6c] sm:$0xff]  }
  0x25   : > { %489 = vrot.lane.b32.xlu0 %v1569_v27, %s1429_s9  ;;  %v361_v43 = vsel %vm349_vm1, %v356_v35, %v360_v32  ;;  %v416_v44 = vor.u32 %v415_v36, %v411_v26  ;;  %v403_v45 = vrot.slane %v401_v37, 1  ;;  %v377_v52 = vshll.u32 %v1583_v42, 16  ;;  %v1338_v17 = vld [vmem:[%s1527_s7 + $0x74] ss:$0 sps:$4 sm:$0x11]  }
  0x26   : > { %v408_v46 = vrot.slane %v406_v38, 1  ;;  %v430_v54 = vshll.u32 %v1587_v47, 16  ;;  %v423_v55 = vshrl.u32 %v1577_v39, 16  ;;  %v427_v56 = vrot.slane %v425_v51, 1  ;;  %v1666_v37 = vld [vmem:[%s1527_s7 + $0x54] sm:$0xff]  }
  0x27   : > { %v1594_v49 = vsel %vm349_vm1, %v416_v44, %v420_v41  ;;  %v404_v50 = vor.u32 %v403_v45, %v399_v34  ;;  %v382_v57 = vshll.u32 %v1591_v48, 16  ;;  %v375_v58 = vshrl.u32 %v1583_v42, 16  ;;  %v1677_v41 = vld [vmem:[%s1527_s7 + $0x24] sm:$0xff]   ;;  %v1330_v45 = vld [vmem:[%s1527_s7 + $0x2c] ss:$0 sps:$4 sm:$0x11]  }
  0x28   : > { %448 = vrot.lane.b32.xlu1 %v373_v40, %s1430_s10  ;;  %v379_v59 = vrot.slane %v377_v52, 1  ;;  %v432_v61 = vrot.slane %v430_v54, 1  ;;  %v428_v62 = vor.u32 %v427_v56, %v423_v55  ;;  %v528_v3 = vshrl.u32 %v1617_v60, 16 }
  0x29   : > { %446 = vrot.lane.b32.xlu0 %v361_v43, %s1430_s10  ;;  %v1601_v53 = vsel %vm349_vm1, %v404_v50, %v408_v46  ;;  %v384_v63 = vrot.slane %v382_v57, 1  ;;  %v530_v6 = vshll.u32 %v1617_v60, 16  ;;  %v555_v7 = vrot.slane %v1617_v60, 1  ;;  %v1329_v43 = vld [vmem:[%s1527_s7 + $0x5c] ss:$0 sps:$4 sm:$0x11]  }
  0x2a   : > { %v380_v5 = vor.u32 %v379_v59, %v375_v58  ;;  %v1633_v10 = vsel %vm349_vm1, %v428_v62, %v432_v61  ;;  %v481_v14 = vrot.slane %v1577_v39, 1  ;;  %v535_v15 = vshll.u32 %v1336_v8, 16  ;;  %v1343_v58 = vld [vmem:[%s2007_s1] sm:$0xff]   ;;  %v1344_v62 = vld [vmem:[%s2007_s1 + $0x8] sm:$0xff]   ;;  %s1435_s7 = smov 64  }
  0x2b   : > { %v532_v11 = vrot.slane %v530_v6, 1  ;;  %v556_v16 = vrot.slane %v1336_v8, 1  ;;  %v599_v19 = vshrl.u32 %v1630_v9, 16  ;;  %v601_v20 = vshll.u32 %v1630_v9, 16  ;;  %1211 = vmatprep.subr.bf16.mxu0 %v1343_v58  ;;  %1237 = vmatprep.subr.bf16.mxu1 %v1343_v58  ;;  %v1346_v8 = vld [vmem:[%s2007_s1 + $0x18] sm:$0xff]  }
  0x2c   : > { %456 = vrot.lane.b32.xlu1 %v1594_v49, %s1430_s10  ;;  %v1637_v13 = vsel %vm349_vm1, %v380_v5, %v384_v63  ;;  %v626_v21 = vrot.slane %v1630_v9, 1  ;;  %v537_v22 = vrot.slane %v535_v15, 1  ;;  %v606_v25 = vshll.u32 %v1338_v17, 16  ;;  %1212 = vmatpush3.bf16.msra.mxu0 %v1343_v58  ;;  %v1345_v63 = vld [vmem:[%s2007_s1 + $0x10] sm:$0xff]   ;;  %v1331_v15 = vld [vmem:[%s1611_s14 + $0x20] sm:$0xff]  }
  0x2d   : > { %454 = vrot.lane.b32.xlu0 %v1601_v53, %s1430_s10  ;;  %v533_v18 = vor.u32 %v532_v11, %v528_v3  ;;  %v1647_v24 = vsel %vm462_vm0, %v555_v7, %v556_v16  ;;  %v627_v26 = vrot.slane %v1338_v17, 1  ;;  %v482_v28 = vrot.slane %v1587_v47, 1  ;;  %1242 = vmatpush3.bf16.msra.mxu1 %v1343_v58  ;;  %v1332_v16 = vld [vmem:[%s1611_s14] sm:$0xff]   ;;  %v1333_v17 = vld [vmem:[%s1611_s14 + $0x28] sm:$0xff]  }
  0x2e   : > { %v603_v29 = vrot.slane %v601_v20, 1  ;;  %v608_v31 = vrot.slane %v606_v25, 1  ;;  %v469_v33 = vrot.slane %v1583_v42, 1  ;;  %v470_v34 = vrot.slane %v1591_v48, 1  ;;  %1213 = vmatprep.subr.bf16.mxu0 %v1344_v62  ;;  %1238 = vmatprep.subr.bf16.mxu1 %v1344_v62 }
  0x2f   : > { %v1653_v30 = vsel %vm349_vm1, %v533_v18, %v537_v22  ;;  %v1656_v32 = vsel %vm462_vm0, %v626_v21, %v627_v26  ;;  %v1663_v36 = vsel %vm462_vm0, %v481_v14, %v482_v28  ;;  %v437_v44 = vshll.u32 %v1666_v37, 16  ;;  %v1334_v18 = vld [vmem:[%s1611_s14 + $0x8] sm:$0xff]  }
  0x30   : > { %518 = vrot.lane.b32.xlu1 %v1577_v39, %s1428_s8  ;;  %v604_v35 = vor.u32 %v603_v29, %v599_v19  ;;  %v389_v46 = vshll.u32 %v1677_v41, 16  ;;  %v442_v48 = vshll.u32 %v1329_v43, 16  ;;  %v387_v50 = vshrl.u32 %v1677_v41, 16  ;;  %1214 = vmatpush3.bf16.msra.mxu0 %v1344_v62  ;;  %v1339_v29 = vld [vmem:[%s1611_s14 + $0x30] sm:$0xff]  }
  0x31   : > { %510 = vrot.lane.b32.xlu0 %v1583_v42, %s1428_s8  ;;  %v439_v47 = vrot.slane %v437_v44, 1  ;;  %v394_v52 = vshll.u32 %v1330_v45, 16  ;;  %1243 = vmatpush3.bf16.msra.mxu1 %v1344_v62  ;;  %v484_v3 = vrot.slane %v1666_v37, 1  ;;  %v485_v5 = vrot.slane %v1329_v43, 1 }
  0x32   : > { %v1669_v38 = vsel %vm349_vm1, %v604_v35, %v608_v31  ;;  %v391_v51 = vrot.slane %v389_v46, 1  ;;  %v444_v55 = vrot.slane %v442_v48, 1  ;;  %1215 = vmatprep.subr.bf16.mxu0 %v1345_v63  ;;  %v472_v6 = vrot.slane %v1677_v41, 1  ;;  %1239 = vmatprep.subr.bf16.mxu1 %v1345_v63 }
  0x33   : > { %v396_v57 = vrot.slane %v394_v52, 1  ;;  %v473_v7 = vrot.slane %v1330_v45, 1  ;;  %v486_v11 = vsel %vm462_vm0, %v484_v3, %v485_v5 }
  0x34   : > { %547 = vrot.lane.b32.xlu1 %v1594_v49, %s1431_s21  ;;  %v392_v56 = vor.u32 %v391_v51, %v387_v50  ;;  %1216 = vmatpush3.bf16.msra.mxu0 %v1345_v63 }
  0x35   : > { %539 = vrot.lane.b32.xlu0 %v373_v40, %s1431_s21  ;;  %v1674_v40 = vsel %vm462_vm0, %v469_v33, %v470_v34  ;;  %1244 = vmatpush3.bf16.msra.mxu1 %v1345_v63  ;;  %v474_v14 = vsel %vm462_vm0, %v472_v6, %v473_v7  ;;  %v1342_v33 = vld [vmem:[%s1611_s14 + $0x18] sm:$0xff]  }
  0x36   : > { %v397_v61 = vsel %vm349_vm1, %v392_v56, %v396_v57  ;;  %1217 = vmatprep.subr.bf16.mxu0 %v1346_v8  ;;  %1240 = vmatprep.subr.bf16.mxu1 %v1346_v8 }
  0x38   : > { %549 = vrot.lane.b32.xlu1 %v1633_v10, %s1431_s21  ;;  %1218 = vmatpush3.bf16.msra.mxu0 %v1346_v8 }
  0x39   : > { %541 = vrot.lane.b32.xlu0 %v1637_v13, %s1431_s21  ;;  %1245 = vmatpush3.bf16.msra.mxu1 %v1346_v8 }
  0x3c   : > { %566 = vrot.lane.b32.xlu1 %v1565_v23, %s1432_s22 }
  0x3d   : > { %558 = vrot.lane.b32.xlu0 %v1569_v27, %s1432_s22  ;;  %v435_v27 = vshrl.u32 %v1666_v37, 16 }
  0x3f   : > { %v440_v54 = vor.u32 %v439_v47, %v435_v27 }
  0x40   : > { %568 = vrot.lane.b32.xlu1 %v1663_v36, %s1432_s22 }
  0x41   : > { %560 = vrot.lane.b32.xlu0 %v1674_v40, %s1432_s22  ;;  %v445_v59 = vsel %vm349_vm1, %v440_v54, %v444_v55 }
  0x44   : > { %587 = vrot.lane.b32.xlu1 %v1577_v39, %s1433_s24 }
  0x45   : > { %579 = vrot.lane.b32.xlu0 %v1583_v42, %s1433_s24 }
  0x48   : > { %589 = vrot.lane.b32.xlu1 %v1666_v37, %s1433_s24 }
  0x49   : > { %581 = vrot.lane.b32.xlu0 %v1677_v41, %s1433_s24 }
  0x4c   : > { %618 = vrot.lane.b32.xlu1 %v1633_v10, %s1434_s26 }
  0x4d   : > { %610 = vrot.lane.b32.xlu0 %v1637_v13, %s1434_s26 }
  0x50   : > { %620 = vrot.lane.b32.xlu1 %v445_v59, %s1434_s26 }
  0x51   : > { %612 = vrot.lane.b32.xlu0 %v397_v61, %s1434_s26 }
  0x54   : > { %637 = vrot.lane.b32.xlu1 %v1663_v36, %s1435_s7 }
  0x55   : > { %629 = vrot.lane.b32.xlu0 %v1674_v40, %s1435_s7 }
  0x58   : > { %458 = vrot.lane.b32.xlu1 %v1633_v10, %s1430_s10  ;;  %v1347_v10 = vld [vmem:[%s2007_s1 + $0x20] sm:$0x3f]  }
  0x59   : > { %450 = vrot.lane.b32.xlu0 %v1637_v13, %s1430_s10  ;;  %1247 = vmatprep.subr.msk.bf16.mxu0 %vm917_vm2, %v1347_v10  ;;  %v919_v13 = vsel %vm917_vm2, %v1347_v10, 0 }
  0x5a   : > { %1248 = vmatprep.subr.msk.bf16.mxu1 %vm917_vm2, %v1347_v10  ;;  %1220 = vmatpush3.bf16.msra.mxu0 %v919_v13 }
  0x5b   : > { %1246 = vmatpush3.bf16.msra.mxu1 %v919_v13 }
  0x5c   : > { %639 = vrot.lane.b32.xlu1 %v486_v11, %s1435_s7 }
  0x5d   : > { %631 = vrot.lane.b32.xlu0 %v474_v14, %s1435_s7 }
  0x60   : > { %693 = vrot.lane.b32.xlu1 %v1331_v15, %s1436_s6 }
  0x61   : > { %685 = vrot.lane.b32.xlu0 %v1332_v16, %s1436_s6 }
  0x64   : > { %460 = vrot.lane.b32.xlu1 %v445_v59, %s1430_s10 }
  0x65   : > { %452 = vrot.lane.b32.xlu0 %v397_v61, %s1430_s10 }
  0x68   : > { %499 = vrot.lane.b32.xlu1 %v1663_v36, %s1429_s9 }
  0x69   : > { %491 = vrot.lane.b32.xlu0 %v1674_v40, %s1429_s9 }
  0x6c   : > { %695 = vrot.lane.b32.xlu1 %v1333_v17, %s1436_s6 }
  0x6d   : > { %687 = vrot.lane.b32.xlu0 %v1334_v18, %s1436_s6 }
  0x70   : > { %501 = vrot.lane.b32.xlu1 %v486_v11, %s1429_s9 }
  0x71   : > { %493 = vrot.lane.b32.xlu0 %v474_v14, %s1429_s9 }
  0x74   : > { %520 = vrot.lane.b32.xlu1 %v1666_v37, %s1428_s8 }
  0x75   : > { %512 = vrot.lane.b32.xlu0 %v1677_v41, %s1428_s8 }
  0x78   : > { %522 = vrot.lane.b32.xlu1 %v1617_v60, %s1428_s8 }
  0x79   : > { %514 = vrot.lane.b32.xlu0 %v1540_v2, %s1428_s8  ;;  %s217_s8 = sand.u32 1, %s1410_s16  }
  0x7c   : > { %551 = vrot.lane.b32.xlu1 %v445_v59, %s1431_s21 }
  0x7d   : > { %543 = vrot.lane.b32.xlu0 %v397_v61, %s1431_s21 }
  0x80   : > { %553 = vrot.lane.b32.xlu1 %v1653_v30, %s1431_s21 }
  0x81   : > { %545 = vrot.lane.b32.xlu0 %v1601_v53, %s1431_s21 }
  0x84   : > { %570 = vrot.lane.b32.xlu1 %v486_v11, %s1432_s22 }
  0x85   : > { %562 = vrot.lane.b32.xlu0 %v474_v14, %s1432_s22 }
  0x88   : > { %572 = vrot.lane.b32.xlu1 %v1647_v24, %s1432_s22 }
  0x89   : > { %564 = vrot.lane.b32.xlu0 %v1553_v12, %s1432_s22  ;;  %s1197_s22 = sshll.u32 %s1418_s18, 9  ;;  %s1958_s18 = scalar_lea.sflag [#allocation3], %s217_s8 }
  0x8a   : > { %s1946_s12 = scalar_lea.hbm %s2010_s4, %s1197_s22 }
  0x8c   : > { %591 = vrot.lane.b32.xlu1 %v1617_v60, %s1433_s24 }
  0x8d   : > { %583 = vrot.lane.b32.xlu0 %v1540_v2, %s1433_s24 }
  0x8e   : > { %v517_v19 = vpop.permute.xlu1 %516  ;;  %v1774_v20 = vpop.permute.xlu0 %508 }
  0x90   : > { %593 = vrot.lane.b32.xlu1 %v1630_v9, %s1433_s24 }
  0x91   : > { %585 = vrot.lane.b32.xlu0 %v1530_v0, %s1433_s24 }
  0x92   : > { %v496_v21 = vpop.permute.xlu1 %495 }
  0x93   : > { %v488_v22 = vpop.permute.xlu0 %487 }
  0x94   : > { %622 = vrot.lane.b32.xlu1 %v1653_v30, %s1434_s26  ;;  %v1340_v30 = vld [vmem:[%s1611_s14 + $0x10] sm:$0xff]  }
  0x95   : > { %614 = vrot.lane.b32.xlu0 %v1601_v53, %s1434_s26 }
  0x96   : > { %v1784_v60 = vpop.permute.xlu1 %497 }
  0x97   : > { %v1786_v25 = vpop.permute.xlu0 %489 }
  0x98   : > { %624 = vrot.lane.b32.xlu1 %v1669_v38, %s1434_s26 }
  0x99   : > { %616 = vrot.lane.b32.xlu0 %v1594_v49, %s1434_s26 }
  0x9a   : > { %v1792_v9 = vpop.permute.xlu1 %448 }
  0x9b   : > { %v447_v26 = vpop.permute.xlu0 %446 }
  0x9c   : > { %641 = vrot.lane.b32.xlu1 %v1647_v24, %s1435_s7  ;;  %v1341_v24 = vld [vmem:[%s1611_s14 + $0x38] sm:$0xff]   ;;  %v703_v55 = vsel %vm701_vm3, %v1544_v4, %v447_v26  ;;  %s1145_s14 = sshll.u32 %s217_s8, 5 }
  0x9d   : > { %633 = vrot.lane.b32.xlu0 %v1553_v12, %s1435_s7  ;;  %v720_v59 = vsel %vm718_vm4, %v703_v55, %v488_v22  ;;  %s1929_s21 = scalar_lea.vmem [#allocation2], %s1145_s14 }
  0x9e   : > { %v1798_v53 = vpop.permute.xlu1 %456  ;;  %s1051_s24 = sshll.u32 %s1929_s21, 4  ;;  %s1950_s24 = int_to_ptr.vmem [resolvable:$true] %s1051_s24 }
  0x9f   : > { %v455_v28 = vpop.permute.xlu0 %454  ;;  %v713_v18 = vsel %vm701_vm3, %v1530_v0, %v1798_v53  ;;  %s1348_s13 = scalar_lea.vmem %s1950_s24, 512  ;;  %p1355_p1 = scmp.lt.s32.totalorder %s1950_s24, %s1353_s30 }
  0xa0   : > { %643 = vrot.lane.b32.xlu1 %v1656_v32, %s1435_s7  ;;  %v711_v52 = vsel %vm701_vm3, %v1540_v2, %v455_v28  ;;  %v730_v22 = vsel %vm718_vm4, %v713_v18, %v1784_v60  ;;  %p1349_p12 = scmp.ne.s32.totalorder %s1950_s24, %s1348_s13  ;;  %p1356_p2 = scmp.lt.s32.totalorder %s1354_s5, %s1348_s13 }
  0xa1   : > { %635 = vrot.lane.b32.xlu0 %v1565_v23, %s1435_s7  ;;  %v728_v56 = vsel %vm718_vm4, %v711_v52, %v496_v21  ;;  %v705_v21 = vsel %vm701_vm3, %v1533_v1, %v1792_v9 }
  0xa2   : > { %v1805_v49 = vpop.permute.xlu1 %518  ;;  %v745_v2 = vsel %vm735_vm6, %v728_v56, %v517_v19  ;;  %p1350_p13 = pnand %p1349_p12, %p1504_p4  ;;  %p1357_p3 = por %p1356_p2, %p1355_p1 }
  0xa3   : > { %v1808_v31 = vpop.permute.xlu0 %510  ;;  %v747_v28 = vsel %vm735_vm6, %v730_v22, %v1805_v49 }
  0xa4   : > { %697 = vrot.lane.b32.xlu1 %v1339_v29, %s1436_s6  ;;  %v722_v29 = vsel %vm718_vm4, %v705_v21, %v1786_v25  ;;  %p1351_p0 = pneg %p1350_p13 }
  0xa5   : > { %689 = vrot.lane.b32.xlu0 %v1340_v30, %s1436_s6  ;;  %v739_v30 = vsel %vm735_vm6, %v722_v29, %v1808_v31 }
  0xa6   : > { %v548_v12 = vpop.permute.xlu1 %547  ;;  %p1358_p5 = pnand %p1357_p3, %p1351_p0 }
  0xa7   : > { %v540_v34 = vpop.permute.xlu0 %539  ;;  %v762_v4 = vsel %vm752_vm5, %v745_v2, %v548_v12 }
  0xa8   : > { %699 = vrot.lane.b32.xlu1 %v1341_v24, %s1436_s6 }
  0xa9   : > { %691 = vrot.lane.b32.xlu0 %v1342_v33, %s1436_s6 }
  0xaa   : > { %v550_v32 = vpop.permute.xlu1 %549 }
  0xab   : > { %v1816_v35 = vpop.permute.xlu0 %541  ;;  %v764_v0 = vsel %vm752_vm5, %v747_v28, %v550_v32 }
  0xac   : > { %v756_v1 = vsel %vm752_vm5, %v739_v30, %v1816_v35 }
  0xae   : > { %v567_v23 = vpop.permute.xlu1 %566 }
  0xaf   : > { %v559_v36 = vpop.permute.xlu0 %558  ;;  %v779_v3 = vsel %vm769_vm7, %v762_v4, %v567_v23 }
  0xb2   : > { %v569_v38 = vpop.permute.xlu1 %568 }
  0xb3   : > { %v1818_v40 = vpop.permute.xlu0 %560  ;;  %v781_v24 = vsel %vm769_vm7, %v764_v0, %v569_v38 }
  0xb4   : > { %v773_v49 = vsel %vm769_vm7, %v756_v1, %v1818_v40 }
  0xb6   : > { %v588_v43 = vpop.permute.xlu1 %587 }
  0xb7   : > { %v580_v44 = vpop.permute.xlu0 %579  ;;  %v796_v6 = vsel %vm786_vm8, %v779_v3, %v588_v43 }
  0xba   : > { %v590_v45 = vpop.permute.xlu1 %589 }
  0xbb   : > { %v582_v46 = vpop.permute.xlu0 %581  ;;  %v798_v60 = vsel %vm786_vm8, %v781_v24, %v590_v45 }
  0xbc   : > { %v790_v25 = vsel %vm786_vm8, %v773_v49, %v582_v46 }
  0xbe   : > { %v619_v27 = vpop.permute.xlu1 %618 }
  0xbf   : > { %v611_v47 = vpop.permute.xlu0 %610 }
  0xc2   : > { %v621_v48 = vpop.permute.xlu1 %620 }
  0xc3   : > { %v613_v50 = vpop.permute.xlu0 %612  ;;  %v815_v12 = vsel %vm803_vm9, %v798_v60, %v621_v48 }
  0xc4   : > { %v807_v31 = vsel %vm803_vm9, %v790_v25, %v613_v50 }
  0xc6   : > { %v638_v51 = vpop.permute.xlu1 %637 }
  0xc7   : > { %v630_v54 = vpop.permute.xlu0 %629 }
  0xca   : > { %v459_v57 = vpop.permute.xlu1 %458 }
  0xcb   : > { %v1827_v58 = vsel %vm701_vm3, %v1577_v39, %v459_v57  ;;  %v451_v61 = vpop.permute.xlu0 %450  ;;  %v737_v39 = vsel %vm735_vm6, %v720_v59, %v1774_v20 }
  0xcc   : > { %v1833_v62 = vsel %vm701_vm3, %v1583_v42, %v451_v61  ;;  %v754_v5 = vsel %vm752_vm5, %v737_v39, %v540_v34  ;;  %v813_v42 = vsel %vm803_vm9, %v796_v6, %v619_v27 }
  0xcd   : > { %v771_v8 = vsel %vm769_vm7, %v754_v5, %v559_v36  ;;  %v830_v14 = vsel %vm820_vm10, %v813_v42, %v638_v51 }
  0xce   : > { %v640_v63 = vpop.permute.xlu1 %639  ;;  %v788_v11 = vsel %vm786_vm8, %v771_v8, %v580_v44 }
  0xcf   : > { %v632_v7 = vpop.permute.xlu0 %631  ;;  %v805_v10 = vsel %vm803_vm9, %v788_v11, %v611_v47  ;;  %v832_v33 = vsel %vm820_vm10, %v815_v12, %v640_v63 }
  0xd0   : > { %v822_v13 = vsel %vm820_vm10, %v805_v10, %v630_v54  ;;  %v824_v23 = vsel %vm820_vm10, %v807_v31, %v632_v7 }
  0xd2   : > { %v694_v15 = vpop.permute.xlu1 %693 }
  0xd3   : > { %v847_v16 = vsel %vm837_vm11, %v830_v14, %v694_v15  ;;  %v686_v17 = vpop.permute.xlu0 %685 }
  0xd4   : > { %1229 = vmatprep.mubr.msk.bf16.mxu1 %vm900_vm12, %v847_v16  ;;  %v839_v19 = vsel %vm837_vm11, %v822_v13, %v686_v17 }
  0xd5   : > { %1221 = vmatprep.mubr.msk.bf16.mxu0 %vm900_vm12, %v839_v19 }
  0xd6   : > { %v461_v20 = vpop.permute.xlu1 %460 }
  0xd7   : > { %v453_v26 = vpop.permute.xlu0 %452  ;;  %v717_v14 = vsel %vm701_vm3, %v1666_v37, %v461_v20 }
  0xda   : > { %v500_v53 = vpop.permute.xlu1 %499 }
  0xdb   : > { %v492_v9 = vpop.permute.xlu0 %491  ;;  %v732_v5 = vsel %vm718_vm4, %v1827_v58, %v500_v53 }
  0xdc   : > { %v724_v8 = vsel %vm718_vm4, %v1833_v62, %v492_v9  ;;  %v709_v62 = vsel %vm701_vm3, %v1677_v41, %v453_v26 }
  0xde   : > { %v696_v34 = vpop.permute.xlu1 %695 }
  0xdf   : > { %v849_v32 = vsel %vm837_vm11, %v832_v33, %v696_v34  ;;  %v688_v35 = vpop.permute.xlu0 %687 }
  0xe0   : > { %1230 = vmatmul.mubr.msk.bf16.vlgmr.msra.gmra.mrb[0].mxu1 %vm900_vm12, %v849_v32  ;;  %v841_v36 = vsel %vm837_vm11, %v824_v23, %v688_v35 }
  0xe1   : > { %1222 = vmatmul.mubr.msk.bf16.vlgmr.msra.gmra.mrb[0].mxu0 %vm900_vm12, %v841_v36 }
  0xe2   : > { %v502_v38 = vpop.permute.xlu1 %501 }
  0xe3   : > { %v494_v40 = vpop.permute.xlu0 %493  ;;  %v734_v16 = vsel %vm718_vm4, %v717_v14, %v502_v38  ;;  %v1177_v38 = vld [vmem:[%s2008_s2] ss:$0 sm:$0xff] }
  0xe4   : > { %v726_v20 = vsel %vm718_vm4, %v709_v62, %v494_v40 }
  0xe6   : > { %v521_v43 = vpop.permute.xlu1 %520 }
  0xe7   : > { %v513_v44 = vpop.permute.xlu0 %512  ;;  %v749_v7 = vsel %vm735_vm6, %v732_v5, %v521_v43 }
  0xe8   : > { %v741_v15 = vsel %vm735_vm6, %v724_v8, %v513_v44 }
  0xea   : > { %v523_v45 = vpop.permute.xlu1 %522 }
  0xeb   : > { %v515_v46 = vpop.permute.xlu0 %514  ;;  %v751_v18 = vsel %vm735_vm6, %v734_v16, %v523_v45 }
  0xec   : > { %v743_v0 = vsel %vm735_vm6, %v726_v20, %v515_v46 }
  0xee   : > { %v552_v27 = vpop.permute.xlu1 %551 }
  0xef   : > { %v544_v47 = vpop.permute.xlu0 %543  ;;  %v766_v42 = vsel %vm752_vm5, %v749_v7, %v552_v27 }
  0xf0   : > { %v758_v58 = vsel %vm752_vm5, %v741_v15, %v544_v47 }
  0xf2   : > { %v554_v48 = vpop.permute.xlu1 %553 }
  0xf3   : > { %v546_v50 = vpop.permute.xlu0 %545  ;;  %v768_v21 = vsel %vm752_vm5, %v751_v18, %v554_v48 }
  0xf4   : > { %v760_v30 = vsel %vm752_vm5, %v743_v0, %v546_v50 }
  0xf6   : > { %v571_v51 = vpop.permute.xlu1 %570 }
  0xf7   : > { %v563_v52 = vpop.permute.xlu0 %562  ;;  %v783_v10 = vsel %vm769_vm7, %v766_v42, %v571_v51 }
  0xf8   : > { %v775_v19 = vsel %vm769_vm7, %v758_v58, %v563_v52 }
  0xfa   : > { %v573_v54 = vpop.permute.xlu1 %572 }
  0xfb   : > { %v565_v55 = vpop.permute.xlu0 %564  ;;  %v785_v53 = vsel %vm769_vm7, %v768_v21, %v573_v54 }
  0xfc   : > { %v777_v9 = vsel %vm769_vm7, %v760_v30, %v565_v55 }
  0xfe   : > { %v592_v56 = vpop.permute.xlu1 %591 }
  0xff   : > { %v584_v57 = vpop.permute.xlu0 %583  ;;  %v800_v13 = vsel %vm786_vm8, %v783_v10, %v592_v56 }
 0x100   : > { %v792_v22 = vsel %vm786_vm8, %v775_v19, %v584_v57 }
 0x102   : > { %v594_v59 = vpop.permute.xlu1 %593 }
 0x103   : > { %v586_v61 = vpop.permute.xlu0 %585  ;;  %v802_v24 = vsel %vm786_vm8, %v785_v53, %v594_v59 }
 0x104   : > { %v794_v25 = vsel %vm786_vm8, %v777_v9, %v586_v61 }
 0x106   : > { %v623_v2 = vpop.permute.xlu1 %622 }
 0x107   : > { %v615_v4 = vpop.permute.xlu0 %614  ;;  %v817_v37 = vsel %vm803_vm9, %v800_v13, %v623_v2 }
 0x108   : > { %v809_v41 = vsel %vm803_vm9, %v792_v22, %v615_v4 }
 0x10a   : > { %v625_v63 = vpop.permute.xlu1 %624 }
 0x10b   : > { %v617_v39 = vpop.permute.xlu0 %616  ;;  %v819_v49 = vsel %vm803_vm9, %v802_v24, %v625_v63 }
 0x10c   : > { %v811_v31 = vsel %vm803_vm9, %v794_v25, %v617_v39 }
 0x10e   : > { %v642_v3 = vpop.permute.xlu1 %641 }
 0x10f   : > { %v634_v6 = vpop.permute.xlu0 %633  ;;  %v834_v28 = vsel %vm820_vm10, %v817_v37, %v642_v3 }
 0x110   : > { %v826_v1 = vsel %vm820_vm10, %v809_v41, %v634_v6 }
 0x112   : > { %v644_v11 = vpop.permute.xlu1 %643 }
 0x113   : > { %v636_v17 = vpop.permute.xlu0 %635  ;;  %v836_v33 = vsel %vm820_vm10, %v819_v49, %v644_v11 }
 0x114   : > { %v828_v23 = vsel %vm820_vm10, %v811_v31, %v636_v17 }
 0x116   : > { %v698_v29 = vpop.permute.xlu1 %697 }
 0x117   : > { %v851_v26 = vsel %vm837_vm11, %v834_v28, %v698_v29  ;;  %v690_v60 = vpop.permute.xlu0 %689 }
 0x118   : > { %1233 = vmatprep.mubr.msk.bf16.mxu1 %vm900_vm12, %v851_v26  ;;  %v843_v12 = vsel %vm837_vm11, %v826_v1, %v690_v60 }
 0x119   : > { %1225 = vmatprep.mubr.msk.bf16.mxu0 %vm900_vm12, %v843_v12 }
 0x11a   : > { %v700_v34 = vpop.permute.xlu1 %699 }
 0x11b   : > { %v853_v32 = vsel %vm837_vm11, %v836_v33, %v700_v34  ;;  %v692_v35 = vpop.permute.xlu0 %691 }
 0x11c   : > { %1234 = vmatmul.mubr.msk.bf16.gmra.mrb[4].mxu1 %vm900_vm12, %v853_v32  ;;  %v845_v36 = vsel %vm837_vm11, %v828_v23, %v692_v35 }
 0x11d   : > { %1226 = vmatmul.mubr.msk.bf16.gmra.mrb[4].mxu0 %vm900_vm12, %v845_v36 }
 0x1b3   : > { %v1231_v40 = vpop.f32.mrb[0].mxu1 }
 0x1b4   : > { %v991_v43 = vadd.f32 %v1231_v40, %v1177_v38  ;;  %v983_v44 = vpop.f32.mrb[1].mxu1  ;;  %v1223_v45 = vpop.f32.mrb[0].mxu0 }
 0x1b5   : > { %v984_v46 = vadd.f32 %v1177_v38, %v983_v44  ;;  %v1232_v27 = vpop.f32.mrb[2].mxu1  ;;  %v963_v47 = vadd.f32 %v1223_v45, %v1177_v38  ;;  %v955_v50 = vpop.f32.mrb[1].mxu0 }
 0x1b6   : > { %v1015_v48 = vmax.f32 %v991_v43, 0.0  ;;  %v986_v51 = vpop.f32.mrb[3].mxu1  ;;  %v956_v52 = vadd.f32 %v1177_v38, %v955_v50  ;;  %v1224_v55 = vpop.f32.mrb[2].mxu0 }
 0x1b7   : > { %v1014_v54 = vmax.f32 %v984_v46, 0.0  ;;  %v1011_v56 = vmax.f32 %v963_v47, 0.0  ;;  %v958_v59 = vpop.f32.mrb[3].mxu0 }
 0x1b8   : > { %v1023_v57 = vpack.c.bf16 %v1015_v48, %v1015_v48  ;;  %v1010_v61 = vmax.f32 %v956_v52, 0.0 }
 0x1b9   : > { %v1022_v2 = vpack.c.bf16 %v1014_v54, %v1014_v54  ;;  %v1019_v4 = vpack.c.bf16 %v1011_v56, %v1011_v56 }
 0x1ba   : > { %1032 = vst.msk [vmem:[%s1929_s21 + $0x14] sm:$0xf] %vm1026_vm13, %v1023_v57  ;;  %v1018_v63 = vpack.c.bf16 %v1010_v61, %v1010_v61 }
 0x1bb   : > { %1031 = vst.msk [vmem:[%s1929_s21 + $0x10] sm:$0xf] %vm1026_vm13, %v1022_v2  ;;  %1028 = vst.msk [vmem:[%s1929_s21 + $0x4] sm:$0xf] %vm1026_vm13, %v1019_v4 }
 0x1bc   : > { %1027 = vst.msk [vmem:[%s1929_s21] sm:$0xf] %vm1026_vm13, %v1018_v63 }
 0x1ef   : > { %v1235_v39 = vpop.f32.mrb[4].mxu1 }
 0x1f0   : > { %v1005_v3 = vadd.f32 %v1235_v39, %v1177_v38  ;;  %v997_v5 = vpop.f32.mrb[5].mxu1  ;;  %v1227_v6 = vpop.f32.mrb[4].mxu0 }
 0x1f1   : > { %v998_v7 = vadd.f32 %v1177_v38, %v997_v5  ;;  %v1236_v8 = vpop.f32.mrb[6].mxu1  ;;  %v977_v42 = vadd.f32 %v1227_v6, %v1177_v38  ;;  %v969_v14 = vpop.f32.mrb[5].mxu0 }
 0x1f2   : > { %v1017_v11 = vmax.f32 %v1005_v3, 0.0  ;;  %v1000_v15 = vpop.f32.mrb[7].mxu1  ;;  %v970_v10 = vadd.f32 %v1177_v38, %v969_v14  ;;  %v1228_v58 = vpop.f32.mrb[6].mxu0 }
 0x1f3   : > { %v1016_v16 = vmax.f32 %v998_v7, 0.0  ;;  %v1013_v13 = vmax.f32 %v977_v42, 0.0  ;;  %v972_v62 = vpop.f32.mrb[7].mxu0 }
 0x1f4   : > { %v1025_v17 = vpack.c.bf16 %v1017_v11, %v1017_v11  ;;  %v1012_v18 = vmax.f32 %v970_v10, 0.0 }
 0x1f5   : > { %v1024_v19 = vpack.c.bf16 %v1016_v16, %v1016_v16  ;;  %v1021_v37 = vpack.c.bf16 %v1013_v13, %v1013_v13 }
 0x1f6   : > { %1034 = vst.msk [vmem:[%s1929_s21 + $0x1c] sm:$0xf] %vm1026_vm13, %v1025_v17  ;;  %v1020_v20 = vpack.c.bf16 %v1012_v18, %v1012_v18 }
 0x1f7   : > { %1033 = vst.msk [vmem:[%s1929_s21 + $0x18] sm:$0xf] %vm1026_vm13, %v1024_v19  ;;  %1030 = vst.msk [vmem:[%s1929_s21 + $0xc] sm:$0xf] %vm1026_vm13, %v1021_v37 }
 0x1f8   : > { %1029 = vst.msk [vmem:[%s1929_s21 + $0x8] sm:$0xf] %vm1026_vm13, %v1020_v20 }
 0x1f9   : > { %1361 = shalt.err (!%p1358_p5)
}
 0x1fa   : > { %s1362_s6 = scalar_lea.hbm %s1946_s12, 512  ;;  %s1366_s10 = scalar_lea.hbm %s2010_s4, 1024 }
 0x1fb   : > { %p1363_p6 = scmp.ne.s32.totalorder %s1946_s12, %s1362_s6  ;;  %p1367_p10 = scmp.lt.u32.totalorder %s1946_s12, %s2010_s4 }
 0x1fc   : > { %p1368_p11 = scmp.lt.u32.totalorder %s1366_s10, %s1362_s6  ;;  %p1370_p13 = scmp.lt.u32.totalorder %s1362_s6, %s1946_s12 }
 0x1fd   : > { %p1364_p7 = pnand %p1363_p6, %p1504_p4 }
 0x1fe   : > { %p1369_p12 = por %p1368_p11, %p1367_p10 }
 0x1ff   : > { %p1365_p9 = pneg %p1364_p7 }
 0x200   : > { %p1371_p0 = por %p1370_p13, %p1369_p12 }
 0x202   : > { %p1372_p1 = pnand %p1371_p0, %p1365_p9 }
 0x204   : > { %1375 = shalt.err (!%p1372_p1)
}
 0x205   : > { %s1438_s22 = smov 4  }
 0x206   : > { %1250 = dma.vmem_to_hbm [thread:$0]  (%p1504_p4), %s1950_s24, 512, %s1946_s12, %s1958_s18, %s1435_s7, %s1435_s7, %s1438_s22  }
 0x207 PF: > { %p1256_p2 = scmp.ge.s32.totalorder %s1426_s20, 2  ;;  %s1066_s26 = sand.u32 1, %s1406_s15  }
 0x208   : > { %s1067_s11 = scalar_lea.sflag [#allocation3], %s1066_s26 }
 0x209   : > { %p1253_p3 = pnand %p1256_p2, %p1511_p8 }
 0x20b   : > { %1401 = dma.done.wait (!%p1253_p3), %s1067_s11, 512  }
 0x20c   : > { %1403 = vsyncadd (!%p1253_p3), %s1067_s11, 4294966784  ;;  %s17_s20 = sadd.s32 1, %s1426_s20   ;;  %s2013_s15 = smov %s1410_s16 }
 0x20d   : > { %p14_p5 = scmp.ge.s32.totalorder %s17_s20, 4   ;;  %s2014_s16 = smov %s1414_s17 }
 0x20e   : > { %s2015_s17 = smov %s1517_s28  ;;  %s2016_s18 = smov %s1422_s19 }
 0x20f   : > { %s2017_s19 = smov %s2019_s23  ;;  %16 = sbr.rel (!%p14_p5) target bundleno = 4 (0x4), region = 76 }
 0x216   :  { %1072 = vsyncpa [#allocation3], 1 }
 0x217   :  { %1074 = vsyncpa [#allocation3 + $0x1], 1 }

</bundles_post_ra>
